<compile_context>
chip_gen: v5e
topology: v5e:2x2
jax: 0.10.0
libtpu: 0.0.40
codegen_flags: <defaults>
</compile_context>

<pallas_src>
import functools
import math

import jax
import jax.numpy as jnp
from jax.experimental import pallas as pl
from jax.experimental.pallas import tpu as pltpu

VMEM_LIMIT = 32 * 1024 * 1024  # safe scoped-VMEM budget on v5e/v6e/v7x


def _pick(dim, pref):
    """Largest usable tile: `pref` if it divides dim, else the full dim."""
    return pref if dim % pref == 0 else dim


# ---------------------------------------------------------------------------
# Tiled linear:  y = x @ w + b  (optional fused ReLU)
# ---------------------------------------------------------------------------
def _linear_kernel(x_ref, w_ref, b_ref, o_ref, acc_ref, *, relu):
    @pl.when(pl.program_id(2) == 0)
    def _():
        acc_ref[...] = jnp.zeros_like(acc_ref)

    acc_ref[...] += jnp.dot(x_ref[...].astype(jnp.bfloat16),
                            w_ref[...].astype(jnp.bfloat16),
                            preferred_element_type=jnp.float32)

    @pl.when(pl.program_id(2) == pl.num_programs(2) - 1)
    def _():
        y = acc_ref[...] + b_ref[...]
        if relu:
            y = jnp.maximum(y, 0.0)
        o_ref[...] = y


def linear(x, w, b, relu=False, tm=128, tn=256, tk=256):
    """x [M, K] @ w [K, N] + b [1, N], bf16 MXU inputs, f32 accumulation."""
    M, K = x.shape
    N = w.shape[1]
    tm, tn, tk = _pick(M, tm), _pick(N, tn), _pick(K, tk)
    grid = (M // tm, N // tn, K // tk)
    return pl.pallas_call(
        functools.partial(_linear_kernel, relu=relu),
        out_shape=jax.ShapeDtypeStruct((M, N), jnp.float32),
        grid_spec=pltpu.PrefetchScalarGridSpec(
            num_scalar_prefetch=0,
            grid=grid,
            in_specs=[
                pl.BlockSpec((tm, tk), lambda i, j, k: (i, k)),
                pl.BlockSpec((tk, tn), lambda i, j, k: (k, j)),
                pl.BlockSpec((1, tn), lambda i, j, k: (0, j)),
            ],
            out_specs=pl.BlockSpec((tm, tn), lambda i, j, k: (i, j)),
            scratch_shapes=[pltpu.VMEM((tm, tn), jnp.float32)],
        ),
        compiler_params=pltpu.CompilerParams(
            dimension_semantics=("parallel", "parallel", "arbitrary"),
            vmem_limit_bytes=VMEM_LIMIT),
    )(x, w, b)


# ---------------------------------------------------------------------------
# Fused: LayerNorm(res + x @ w + b)   (attention output projection epilogue)
# ---------------------------------------------------------------------------
def _linear_add_ln_kernel(x_ref, w_ref, b_ref, r_ref, g_ref, be_ref, o_ref):
    y = jnp.dot(x_ref[...].astype(jnp.bfloat16),
                w_ref[...].astype(jnp.bfloat16),
                preferred_element_type=jnp.float32) + b_ref[...]
    z = y + r_ref[...]
    mu = jnp.mean(z, axis=-1, keepdims=True)
    zc = z - mu
    var = jnp.mean(zc * zc, axis=-1, keepdims=True)
    o_ref[...] = zc * jax.lax.rsqrt(var + 1e-5) * g_ref[...] + be_ref[...]


def linear_add_ln(x, w, b, res, gamma, beta, tm=128):
    M, K = x.shape
    N = w.shape[1]
    tm = _pick(M, tm)
    return pl.pallas_call(
        _linear_add_ln_kernel,
        out_shape=jax.ShapeDtypeStruct((M, N), jnp.float32),
        grid=(M // tm,),
        in_specs=[
            pl.BlockSpec((tm, K), lambda i: (i, 0)),
            pl.BlockSpec((K, N), lambda i: (0, 0)),
            pl.BlockSpec((1, N), lambda i: (0, 0)),
            pl.BlockSpec((tm, N), lambda i: (i, 0)),
            pl.BlockSpec((1, N), lambda i: (0, 0)),
            pl.BlockSpec((1, N), lambda i: (0, 0)),
        ],
        out_specs=pl.BlockSpec((tm, N), lambda i: (i, 0)),
        compiler_params=pltpu.CompilerParams(
            dimension_semantics=("parallel",), vmem_limit_bytes=VMEM_LIMIT),
    )(x, w, b, res, gamma, beta)


# ---------------------------------------------------------------------------
# Fused FFN: LayerNorm(x + relu(x@w1 + b1) @ w2 + b2)
# ---------------------------------------------------------------------------
def _ffn_add_ln_kernel(x_ref, w1_ref, b1_ref, w2_ref, b2_ref, g_ref, be_ref, o_ref):
    x = x_ref[...]
    h = jnp.maximum(jnp.dot(x.astype(jnp.bfloat16), w1_ref[...],
                            preferred_element_type=jnp.float32) + b1_ref[...], 0.0)
    y = jnp.dot(h.astype(jnp.bfloat16), w2_ref[...],
                preferred_element_type=jnp.float32) + b2_ref[...]
    z = x + y
    mu = jnp.mean(z, axis=-1, keepdims=True)
    zc = z - mu
    var = jnp.mean(zc * zc, axis=-1, keepdims=True)
    o_ref[...] = zc * jax.lax.rsqrt(var + 1e-5) * g_ref[...] + be_ref[...]


def ffn_add_ln(x, w1, b1, w2, b2, gamma, beta, tm=128):
    # TODO(synk): for production dim_ff, tile the hidden (F) axis with a K-grid
    #             + VMEM accumulator; at these sizes everything fits VMEM.
    M, D = x.shape
    F = w1.shape[1]
    tm = _pick(M, tm)
    return pl.pallas_call(
        _ffn_add_ln_kernel,
        out_shape=jax.ShapeDtypeStruct((M, D), jnp.float32),
        grid=(M // tm,),
        in_specs=[
            pl.BlockSpec((tm, D), lambda i: (i, 0)),
            pl.BlockSpec((D, F), lambda i: (0, 0)),
            pl.BlockSpec((1, F), lambda i: (0, 0)),
            pl.BlockSpec((F, D), lambda i: (0, 0)),
            pl.BlockSpec((1, D), lambda i: (0, 0)),
            pl.BlockSpec((1, D), lambda i: (0, 0)),
            pl.BlockSpec((1, D), lambda i: (0, 0)),
        ],
        out_specs=pl.BlockSpec((tm, D), lambda i: (i, 0)),
        compiler_params=pltpu.CompilerParams(
            dimension_semantics=("parallel",), vmem_limit_bytes=VMEM_LIMIT),
    )(x, w1, b1, w2, b2, gamma, beta)


# ---------------------------------------------------------------------------
# Multi-head attention: all heads per grid step, lane-dense [Sq, H*Dh] output
# ---------------------------------------------------------------------------
def _attn_core(q, k, v, m, o_ref, num_heads, scale):
    """q [Sq, D], k/v [Sk, D], m [Sq, Sk] or None. Writes o_ref[0] = [Sq, D]."""
    D = q.shape[-1]
    Dh = D // num_heads
    outs = []
    for h in range(num_heads):
        qh = q[:, h * Dh:(h + 1) * Dh].astype(jnp.bfloat16)
        kh = k[:, h * Dh:(h + 1) * Dh].astype(jnp.bfloat16)
        vh = v[:, h * Dh:(h + 1) * Dh].astype(jnp.bfloat16)
        s = jax.lax.dot_general(qh, kh, (((1,), (1,)), ((), ())),
                                preferred_element_type=jnp.float32) * scale
        if m is not None:
            s = s + m
        s = s - jnp.max(s, axis=-1, keepdims=True)
        p = jnp.exp(s)
        l = jnp.sum(p, axis=-1, keepdims=True)
        oh = jnp.dot(p.astype(jnp.bfloat16), vh, preferred_element_type=jnp.float32)
        # Normalize only the [Sq, Dh] output; reciprocal goes to the EUP slot.
        outs.append(oh * pl.reciprocal(l, approx=True))
    o_ref[0] = jnp.concatenate(outs, axis=-1)     # lane-dense [Sq, D] store


def _self_attn_kernel(qkv_ref, m_ref, o_ref, *, num_heads, scale):
    D = o_ref.shape[-1]
    t = qkv_ref[0]                                # [S, 3D]; split on the lane axis
    _attn_core(t[:, :D], t[:, D:2 * D], t[:, 2 * D:], m_ref[0], o_ref,
               num_heads, scale)


def _cross_attn_kernel(q_ref, kv_ref, o_ref, *, num_heads, scale):
    D = o_ref.shape[-1]
    kv = kv_ref[0]                                # [Sk, 2D]
    _attn_core(q_ref[0], kv[:, :D], kv[:, D:], None, o_ref, num_heads, scale)


def self_attention(qkv, mask_add, num_heads, scale):
    """qkv [B, S, 3D], mask_add [B, S, S] additive -> [B, S, D]."""
    B, S, D3 = qkv.shape
    D = D3 // 3
    return pl.pallas_call(
        functools.partial(_self_attn_kernel, num_heads=num_heads, scale=scale),
        out_shape=jax.ShapeDtypeStruct((B, S, D), jnp.float32),
        grid=(B,),
        in_specs=[
            pl.BlockSpec((1, S, D3), lambda i: (i, 0, 0)),
            pl.BlockSpec((1, S, S), lambda i: (i, 0, 0)),   # per-batch mask only
        ],
        out_specs=pl.BlockSpec((1, S, D), lambda i: (i, 0, 0)),
        compiler_params=pltpu.CompilerParams(
            dimension_semantics=("parallel",), vmem_limit_bytes=VMEM_LIMIT),
    )(qkv, mask_add)


def cross_attention(q, kv, num_heads, scale):
    """q [B, Sq, D], kv [B, Sk, 2D] -> [B, Sq, D].  No mask input (enc_mask=None)."""
    B, Sq, D = q.shape
    Sk = kv.shape[1]
    return pl.pallas_call(
        functools.partial(_cross_attn_kernel, num_heads=num_heads, scale=scale),
        out_shape=jax.ShapeDtypeStruct((B, Sq, D), jnp.float32),
        grid=(B,),
        in_specs=[
            pl.BlockSpec((1, Sq, D), lambda i: (i, 0, 0)),
            pl.BlockSpec((1, Sk, 2 * D), lambda i: (i, 0, 0)),
        ],
        out_specs=pl.BlockSpec((1, Sq, D), lambda i: (i, 0, 0)),
        compiler_params=pltpu.CompilerParams(
            dimension_semantics=("parallel",), vmem_limit_bytes=VMEM_LIMIT),
    )(q, kv)


# ---------------------------------------------------------------------------
# 3x3 conv + ReLU: in-kernel im2col from the padded VMEM tile, single MXU matmul
# ---------------------------------------------------------------------------
def _conv3x3_kernel(x_ref, w_ref, b_ref, o_ref, *, H, W):
    xp = x_ref[0]                                 # [H+2, W+2, Cin] (VMEM, loaded once)
    taps = [xp[kh:kh + H, kw:kw + W, :] for kh in range(3) for kw in range(3)]
    cols = jnp.concatenate(taps, axis=-1)         # [H, W, 9*Cin]
    cols = cols.reshape(H * W, cols.shape[-1]).astype(jnp.bfloat16)
    y = jnp.dot(cols, w_ref[...], preferred_element_type=jnp.float32) + b_ref[...]
    o_ref[0] = jnp.maximum(y, 0.0)                # fused bias + ReLU


def conv3x3_relu(x_nhwc, w, b):
    """3x3 same-padding conv + ReLU.  x [B,H,W,Cin], w [9*Cin,Cout], b [1,Cout]."""
    B, H, W, Cin = x_nhwc.shape
    Cout = w.shape[-1]
    xp = jnp.pad(x_nhwc, ((0, 0), (1, 1), (1, 1), (0, 0)))   # only 1-pixel halo in HBM
    out = pl.pallas_call(
        functools.partial(_conv3x3_kernel, H=H, W=W),
        out_shape=jax.ShapeDtypeStruct((B, H * W, Cout), jnp.float32),
        grid=(B,),
        in_specs=[
            pl.BlockSpec((1, H + 2, W + 2, Cin), lambda i: (i, 0, 0, 0)),
            pl.BlockSpec((9 * Cin, Cout), lambda i: (0, 0)),
            pl.BlockSpec((1, Cout), lambda i: (0, 0)),
        ],
        out_specs=pl.BlockSpec((1, H * W, Cout), lambda i: (i, 0, 0)),
        compiler_params=pltpu.CompilerParams(
            dimension_semantics=("parallel",), vmem_limit_bytes=VMEM_LIMIT),
    )(xp, w, b)
    return out.reshape(B, H, W, Cout)


# ---------------------------------------------------------------------------
# Model glue (reshapes, masks, PE, parameter plumbing in plain JAX)
# ---------------------------------------------------------------------------
def avgpool2(x):
    B, H, W, C = x.shape
    return x.reshape(B, H // 2, 2, W // 2, 2, C).mean(axis=(2, 4))


def sinusoidal_pe(seq_len, d):
    pos = jnp.arange(seq_len, dtype=jnp.float32)[:, None]
    i = jnp.arange(d // 2, dtype=jnp.float32)[None, :]
    angle = pos / jnp.power(10000.0, 2.0 * i / d)
    pe = jnp.zeros((seq_len, d), jnp.float32)
    pe = pe.at[:, 0::2].set(jnp.sin(angle))
    pe = pe.at[:, 1::2].set(jnp.cos(angle))
    return pe


def mha_self(x, p, mask_add, num_heads, ln_g, ln_b):
    B, S, D = x.shape
    qkv = linear(x.reshape(-1, D), p['wqkv'], p['bqkv']).reshape(B, S, 3 * D)
    o = self_attention(qkv, mask_add, num_heads, 1.0 / math.sqrt(D // num_heads))
    # fused: output projection + residual add + LayerNorm
    return linear_add_ln(o.reshape(-1, D), p['wo'], p['bo'],
                         x.reshape(-1, D), ln_g, ln_b).reshape(B, S, D)


def mha_cross(x, enc, p, num_heads, ln_g, ln_b):
    B, Sq, D = x.shape
    Sk = enc.shape[1]
    q = linear(x.reshape(-1, D), p['wq'], p['bq']).reshape(B, Sq, D)
    kv = linear(enc.reshape(-1, D), p['wkv'], p['bkv']).reshape(B, Sk, 2 * D)
    o = cross_attention(q, kv, num_heads, 1.0 / math.sqrt(D // num_heads))
    return linear_add_ln(o.reshape(-1, D), p['wo'], p['bo'],
                         x.reshape(-1, D), ln_g, ln_b).reshape(B, Sq, D)


def decoder_layer(x, enc, p, self_mask, num_heads):
    B, S, D = x.shape
    x = mha_self(x, p['self'], self_mask, num_heads, p['ln1_g'], p['ln1_b'])
    x = mha_cross(x, enc, p['cross'], num_heads, p['ln2_g'], p['ln2_b'])
    x = ffn_add_ln(x.reshape(-1, D), p['w1'], p['b1'], p['w2'], p['b2'],
                   p['ln3_g'], p['ln3_b']).reshape(B, S, D)
    return x


def encoder_forward(src_nchw, p, dim_model):
    x = jnp.transpose(src_nchw, (0, 2, 3, 1))        # NCHW -> NHWC (channels on lanes)
    x = avgpool2(conv3x3_relu(x, p['conv1_w'], p['conv1_b']))
    x = avgpool2(conv3x3_relu(x, p['conv2_w'], p['conv2_b']))
    B, Hf, Wf, C = x.shape
    seq = linear(x.reshape(B * Hf * Wf, C), p['proj_w'], p['proj_b'])
    seq = seq.reshape(B, Hf * Wf, dim_model)
    return seq + sinusoidal_pe(Hf * Wf, dim_model)[None]


def transformer_forward(params, src, trg, *, pad_idx, num_heads, num_layers, dim_model):
    B, S = trg.shape
    # _make_trg_mask: boolean upper triangle (True hides future) combined with the
    # target pad mask, realized as a [B, S, S] additive mask (never B*H broadcast).
    future = jnp.triu(jnp.ones((S, S), dtype=bool), k=1)
    pad = (trg == pad_idx)
    masked = future[None, :, :] | pad[:, None, :]
    self_mask_add = jnp.where(masked, -1e9, 0.0).astype(jnp.float32)

    enc = encoder_forward(src, params['enc'], dim_model)

    emb = jnp.take(params['dec']['emb'], trg, axis=0) * math.sqrt(dim_model)
    x = emb + sinusoidal_pe(S, dim_model)[None]
    for l in range(num_layers):
        x = decoder_layer(x, enc, params['dec']['layers'][l], self_mask_add, num_heads)
    logits = linear(x.reshape(-1, dim_model),
                    params['dec']['out_w'], params['dec']['out_b'])
    return logits.reshape(B, S, -1)


# ---------------------------------------------------------------------------
# Deterministic parameter init (matmul weights stored in bf16 for the MXU)
# ---------------------------------------------------------------------------
def init_params(key, *, vocab, dim_model, dim_ff, num_heads, num_layers, c1, c2):
    keys = iter(jax.random.split(key, 256))
    D = dim_model

    def w_init(shape, scale=0.02):
        return (jax.random.normal(next(keys), shape, jnp.float32) * scale
                ).astype(jnp.bfloat16)

    def zeros(shape):
        return jnp.zeros(shape, jnp.float32)

    def ones(shape):
        return jnp.ones(shape, jnp.float32)

    enc = dict(
        conv1_w=w_init((9 * 1, c1)), conv1_b=zeros((1, c1)),
        conv2_w=w_init((9 * c1, c2)), conv2_b=zeros((1, c2)),
        proj_w=w_init((c2, D)), proj_b=zeros((1, D)),
    )

    layers = []
    for _ in range(num_layers):
        layers.append(dict(
            self=dict(wqkv=w_init((D, 3 * D)), bqkv=zeros((1, 3 * D)),
                      wo=w_init((D, D)), bo=zeros((1, D))),
            cross=dict(wq=w_init((D, D)), bq=zeros((1, D)),
                       wkv=w_init((D, 2 * D)), bkv=zeros((1, 2 * D)),
                       wo=w_init((D, D)), bo=zeros((1, D))),
            ln1_g=ones((1, D)), ln1_b=zeros((1, D)),
            ln2_g=ones((1, D)), ln2_b=zeros((1, D)),
            ln3_g=ones((1, D)), ln3_b=zeros((1, D)),
            w1=w_init((D, dim_ff)), b1=zeros((1, dim_ff)),
            w2=w_init((dim_ff, D)), b2=zeros((1, D)),
        ))

    dec = dict(
        emb=jax.random.normal(next(keys), (vocab, D), jnp.float32) * 0.02,
        layers=layers,
        out_w=w_init((D, vocab)), out_b=zeros((1, vocab)),
    )
    return dict(enc=enc, dec=dec)


if __name__ == "__main__":
    key = jax.random.PRNGKey(0)
    B, H, W = 2, 16, 16
    S = 8
    # lane-dense toy dims (multiples of 128 where it matters)
    vocab, dim_model, dim_ff = 128, 128, 256
    num_heads, num_layers = 8, 2
    pad_idx = 0

    k1, k2, k3 = jax.random.split(key, 3)
    src = jax.random.normal(k1, (B, 1, H, W), jnp.float32)      # [batch, 1, H, W]
    trg = jax.random.randint(k2, (B, S), 1, vocab, dtype=jnp.int32)
    trg = trg.at[:, -2:].set(pad_idx)                           # trailing padding

    params = init_params(k3, vocab=vocab, dim_model=dim_model, dim_ff=dim_ff,
                         num_heads=num_heads, num_layers=num_layers, c1=32, c2=128)

    out = transformer_forward(params, src, trg, pad_idx=pad_idx,
                              num_heads=num_heads, num_layers=num_layers,
                              dim_model=dim_model)
    jax.block_until_ready(out)
    assert out.shape == (B, S, vocab), out.shape
    print("KERNEL_OK")
</pallas_src>

<mosaic_0001>
module attributes {stable_mosaic.version = 11 : i64} {
  func.func @_conv3x3_kernel(%arg0: i32, %arg1: memref<1x18x18x1xf32, #tpu.memory_space<vmem>>, %arg2: memref<9x32xbf16, #tpu.memory_space<vmem>>, %arg3: memref<1x32xf32, #tpu.memory_space<vmem>>, %arg4: memref<1x256x32xf32, #tpu.memory_space<vmem>>) attributes {dimension_semantics = [#tpu.dimension_semantics<parallel>], iteration_bounds = array<i64: 2>, scalar_prefetch = 0 : i64, scratch_operands = 0 : i64, tpu.core_type = #tpu.core_type<tc>, window_params = [{transform_indices = @transform_0, window_bounds = array<i64: 1, 18, 18, 1>}, {pipeline_mode = #tpu.pipeline_mode<synchronous>, transform_indices = @transform_1, window_bounds = array<i64: 9, 32>}, {pipeline_mode = #tpu.pipeline_mode<synchronous>, transform_indices = @transform_2, window_bounds = array<i64: 1, 32>}, {transform_indices = @transform_3, window_bounds = array<i64: 1, 256, 32>}]} {
    %c0 = arith.constant 0 : index
    %c0_0 = arith.constant 0 : index
    %c0_1 = arith.constant 0 : index
    %c0_2 = arith.constant 0 : index
    %0 = vector.load %arg1[%c0, %c0_0, %c0_1, %c0_2] : memref<1x18x18x1xf32, #tpu.memory_space<vmem>>, vector<1x18x18x1xf32>
    %1 = vector.shape_cast %0 : vector<1x18x18x1xf32> to vector<18x18x1xf32>
    %2 = vector.extract_strided_slice %1 {offsets = [0, 0, 0], sizes = [16, 16, 1], strides = [1, 1, 1]} : vector<18x18x1xf32> to vector<16x16x1xf32>
    %3 = vector.extract_strided_slice %1 {offsets = [0, 1, 0], sizes = [16, 16, 1], strides = [1, 1, 1]} : vector<18x18x1xf32> to vector<16x16x1xf32>
    %4 = vector.extract_strided_slice %1 {offsets = [0, 2, 0], sizes = [16, 16, 1], strides = [1, 1, 1]} : vector<18x18x1xf32> to vector<16x16x1xf32>
    %5 = vector.extract_strided_slice %1 {offsets = [1, 0, 0], sizes = [16, 16, 1], strides = [1, 1, 1]} : vector<18x18x1xf32> to vector<16x16x1xf32>
    %6 = vector.extract_strided_slice %1 {offsets = [1, 1, 0], sizes = [16, 16, 1], strides = [1, 1, 1]} : vector<18x18x1xf32> to vector<16x16x1xf32>
    %7 = vector.extract_strided_slice %1 {offsets = [1, 2, 0], sizes = [16, 16, 1], strides = [1, 1, 1]} : vector<18x18x1xf32> to vector<16x16x1xf32>
    %8 = vector.extract_strided_slice %1 {offsets = [2, 0, 0], sizes = [16, 16, 1], strides = [1, 1, 1]} : vector<18x18x1xf32> to vector<16x16x1xf32>
    %9 = vector.extract_strided_slice %1 {offsets = [2, 1, 0], sizes = [16, 16, 1], strides = [1, 1, 1]} : vector<18x18x1xf32> to vector<16x16x1xf32>
    %10 = vector.extract_strided_slice %1 {offsets = [2, 2, 0], sizes = [16, 16, 1], strides = [1, 1, 1]} : vector<18x18x1xf32> to vector<16x16x1xf32>
    %11 = tpu.concatenate %2, %3, %4, %5, %6, %7, %8, %9, %10 in 2 : vector<16x16x1xf32>, vector<16x16x1xf32>, vector<16x16x1xf32>, vector<16x16x1xf32>, vector<16x16x1xf32>, vector<16x16x1xf32>, vector<16x16x1xf32>, vector<16x16x1xf32>, vector<16x16x1xf32> -> vector<16x16x9xf32>
    %12 = vector.shape_cast %11 : vector<16x16x9xf32> to vector<256x9xf32>
    %13 = arith.truncf %12 : vector<256x9xf32> to vector<256x9xbf16>
    %c0_3 = arith.constant 0 : index
    %c0_4 = arith.constant 0 : index
    %14 = vector.load %arg2[%c0_3, %c0_4] : memref<9x32xbf16, #tpu.memory_space<vmem>>, vector<9x32xbf16>
    %cst = arith.constant dense<0.000000e+00> : vector<256x32xf32>
    %15 = tpu.matmul %13, %14, %cst {dimension_numbers = #tpu.dot_dimension_numbers<[1], [0], [0], [1], [0, 0, 1, 1], [], []>} : vector<256x9xbf16>, vector<9x32xbf16>, vector<256x32xf32> -> vector<256x32xf32>
    %c0_5 = arith.constant 0 : index
    %c0_6 = arith.constant 0 : index
    %16 = vector.load %arg3[%c0_5, %c0_6] : memref<1x32xf32, #tpu.memory_space<vmem>>, vector<1x32xf32>
    %17 = vector.broadcast %16 : vector<1x32xf32> to vector<256x32xf32>
    %18 = arith.addf %15, %17 : vector<256x32xf32>
    %cst_7 = arith.constant 0.000000e+00 : f32
    %19 = vector.broadcast %cst_7 : f32 to vector<256x32xf32>
    %20 = arith.maximumf %18, %19 : vector<256x32xf32>
    %c0_8 = arith.constant 0 : index
    %c0_9 = arith.constant 0 : index
    %c0_10 = arith.constant 0 : index
    %21 = vector.load %arg4[%c0_8, %c0_9, %c0_10] : memref<1x256x32xf32, #tpu.memory_space<vmem>>, vector<1x256x32xf32>
    %22 = vector.shape_cast %21 : vector<1x256x32xf32> to vector<256x32xf32>
    %23 = vector.shape_cast %20 : vector<256x32xf32> to vector<1x256x32xf32>
    tpu.vector_store %arg4[%c0_8, %c0_9, %c0_10], %23 {strides = array<i32>} : memref<1x256x32xf32, #tpu.memory_space<vmem>>, vector<1x256x32xf32>,
    return
  }
  func.func @transform_0(%arg0: i32) -> (i32, i32, i32, i32) {
    %c0_i32 = arith.constant 0 : i32
    %c0_i32_0 = arith.constant 0 : i32
    %c0_i32_1 = arith.constant 0 : i32
    %c0_i32_2 = arith.constant 0 : i32
    return %arg0, %c0_i32, %c0_i32_0, %c0_i32_1 : i32, i32, i32, i32
  }
  func.func @transform_1(%arg0: i32) -> (i32, i32) {
    %c0_i32 = arith.constant 0 : i32
    %c0_i32_0 = arith.constant 0 : i32
    %c0_i32_1 = arith.constant 0 : i32
    return %c0_i32, %c0_i32_0 : i32, i32
  }
  func.func @transform_2(%arg0: i32) -> (i32, i32) {
    %c0_i32 = arith.constant 0 : i32
    %c0_i32_0 = arith.constant 0 : i32
    %c0_i32_1 = arith.constant 0 : i32
    return %c0_i32, %c0_i32_0 : i32, i32
  }
  func.func @transform_3(%arg0: i32) -> (i32, i32, i32) {
    %c0_i32 = arith.constant 0 : i32
    %c0_i32_0 = arith.constant 0 : i32
    %c0_i32_1 = arith.constant 0 : i32
    return %arg0, %c0_i32, %c0_i32_0 : i32, i32, i32
  }
}

</mosaic_0001>

<bundles_post_ra>
// kernel: tpu_custom_call.1
= control target key start
LH: loop header
LB: loop body
LE: loop exit
PB: predicated region body
PF: predicated region fallthrough
CT: control target
= control target key end

     0   :  { %s2545_s12 = smov 0   ;;  %s4027_s0 = inlined_call_operand.vmem [shape: f32[2,18,18,1], index: 0, kind: input, shape index: {}]   ;;  %s4028_s1 = inlined_call_operand.vmem [shape: bf16[9,32], index: 1, kind: input, shape index: {}]   ;;  %s4029_s2 = inlined_call_operand.vmem [shape: f32[1,32], index: 2, kind: input, shape index: {}]   ;;  %s4030_s3 = inlined_call_operand.vmem [shape: f32[2,256,32], index: 3, kind: output, shape index: {}]  }
   0x1 LB: > { %s1786_s13 = sadd.s32 4294967295, %s2514_s12   ;;  %p1790_p0 = scmp.ge.s32.totalorder %s2514_s12, 1  ;;  %s2514_s12 = sphi %s2545_s12, %s13_s12  }
   0x2   : > { %p137_p1 = scmp.lt.s32.totalorder %s2514_s12, 3 }
   0x4   : > { %p138_p2 = pnand %p1790_p0, %p137_p1 }
   0x6   : > { %141 = sbr.rel (%p138_p2) target bundleno = 621 (0x26d), region = 32 }
   0xb   : > { %p161_p3 = scmp.lt.s32.totalorder %s1786_s13, 1  ;;  %vm274_vm0 = vcmask 1046528   ;;  %s2516_s18 = smov 1   ;;  %vm451_vm1 = vcmask 1045504   ;;  %vm1263_vm2 = vcmask 15360   ;;  %vm1230_vm3 = vcmask 7168  }
   0xc   : > { %s2517_s19 = smov 2   ;;  %s2518_s20 = smov 3   ;;  %vm1296_vm4 = vcmask 23552   ;;  %vm1329_vm5 = vcmask 31744   ;;  %vm1362_vm6 = vcmask 39936   ;;  %vm1395_vm7 = vcmask 48128  }
   0xd   : > { %s4146_s13 = smov (!%p161_p3, %s1786_s13), 1  ;;  %s2519_s21 = smov 4   ;;  %vm1570_vm8 = vcmask 1043456   ;;  %vm1571_vm9 = vcmask 1044480   ;;  %vm1461_vm10 = vcmask 64512   ;;  %vm1428_vm11 = vcmask 56320  }
   0xe   : > { %s1821_s14 = smul.u32 432, %s4146_s13  ;;  %s2520_s22 = smov 5   ;;  %vm1521_vm12 = vcmask 72704   ;;  %vm1698_vm13 = vcmask 261120  }
   0xf   : > { %s2521_s23 = smov 6   ;;  %s2522_s24 = smov 8  }
  0x10   : > { %s2559_s17 = scalar_lea.vmem %s4027_s0, %s1821_s14  ;;  %s2523_s25 = smov 7  }
  0x11   : > { %v2562_v0 = vld [vmem:[%s2559_s17 + $0x60] sm:$0xff]  ;;  %v2565_v1 = vld [vmem:[%s2559_s17 + $0x68] sm:$0xff]  ;;  %v2568_v2 = vld [vmem:[%s2559_s17 + $0x70] sm:$0x3]  ;;  %s1816_s5 = sshll.u32 %s4146_s13, 8 }
  0x12   : > { %v295_v3 = vrot.slane %v2562_v0, 1  ;;  %v296_v4 = vrot.slane %v2565_v1, 1  ;;  %v298_v5 = vrot.slane %v2568_v2, 1  ;;  %v2574_v6 = vld [vmem:[%s2559_s17 + $0x30] sm:$0xff]  ;;  %v2577_v7 = vld [vmem:[%s2559_s17 + $0x38] sm:$0xff]  ;;  %v2585_v11 = vld [vmem:[%s2559_s17] sm:$0xff]  ;;  %s3927_s8 = scalar_lea.vmem %s4030_s3, %s1816_s5 }
  0x13   : > { %v2580_v8 = vld [vmem:[%s2559_s17 + $0x40] sm:$0x3]  ;;  %v285_v9 = vrot.slane %v2574_v6, 1  ;;  %v286_v10 = vrot.slane %v2577_v7, 1  ;;  %4071 = vst [vmem:[#allocation2_spill] sm:$0xff] %v2585_v11  ;;  %v2588_v12 = vld [vmem:[%s2559_s17 + $0x8] sm:$0xff] }
  0x14   : > { %v297_v13 = vsel %vm274_vm0, %v295_v3, %v296_v4  ;;  %v299_v14 = vsel %vm274_vm0, %v296_v4, %v298_v5  ;;  %v288_v15 = vrot.slane %v2580_v8, 1  ;;  %v2594_v16 = vld [vmem:[%s2559_s17 + $0x10] sm:$0x3]  ;;  %v2597_v17 = vld [vmem:[%s2559_s17 + $0x78] sm:$0xff]  ;;  %v2600_v18 = vld [vmem:[%s2559_s17 + $0x80] sm:$0xff]  ;;  %v275_v21 = vrot.slane %v2585_v11, 1 }
  0x15   : > { %v2602_v19 = vpack.i.bf16 %v299_v14, %v297_v13  ;;  %v287_v20 = vsel %vm274_vm0, %v285_v9, %v286_v10  ;;  %v276_v22 = vrot.slane %v2588_v12, 1  ;;  %v2608_v23 = vld [vmem:[%s2559_s17 + $0x88] sm:$0x3]  ;;  %v2614_v25 = vld [vmem:[%s2559_s17 + $0x50] sm:$0xff]  ;;  %v278_v27 = vrot.slane %v2594_v16, 1  ;;  %v2623_v30 = vld [vmem:[%s2559_s17 + $0x18] sm:$0xff] }
  0x16   : > { %v2611_v24 = vld [vmem:[%s2559_s17 + $0x48] sm:$0xff]  ;;  %v289_v26 = vsel %vm274_vm0, %v286_v10, %v288_v15  ;;  %v300_v28 = vrot.slane %v2597_v17, 1  ;;  %v2620_v29 = vld [vmem:[%s2559_s17 + $0x58] sm:$0x3]  ;;  %v301_v33 = vrot.slane %v2600_v18, 1  ;;  %v303_v34 = vrot.slane %v2608_v23, 1 }
  0x17   : > { %4072 = vst [vmem:[#allocation3_spill] sm:$0xff] %v2602_v19  ;;  %1860 = vrot.lane.b32.xlu2 %v2602_v19, %s2516_s18  ;;  %v2627_v31 = vpack.i.bf16 %v289_v26, %v287_v20  ;;  %v277_v32 = vsel %vm274_vm0, %v275_v21, %v276_v22  ;;  %v2633_v35 = vld [vmem:[%s2559_s17 + $0x20] sm:$0xff]  ;;  %v2636_v36 = vld [vmem:[%s2559_s17 + $0x28] sm:$0x3]  ;;  %v279_v37 = vsel %vm274_vm0, %v276_v22, %v278_v27  ;;  %v290_v38 = vrot.slane %v2611_v24, 1  ;;  %v2669_v56 = vld [vmem:[%s2559_s17 + $0xb0] sm:$0xff] }
  0x18   : > { %v291_v39 = vrot.slane %v2614_v25, 1  ;;  %v293_v40 = vrot.slane %v2620_v29, 1  ;;  %v2643_v41 = vld [vmem:[%s2559_s17 + $0xc0] sm:$0xff]  ;;  %v2646_v42 = vld [vmem:[%s2559_s17 + $0xc8] sm:$0xff]  ;;  %v1839_v43 = vpack.i.bf16 %v279_v37, %v277_v32  ;;  %v302_v44 = vsel %vm274_vm0, %v300_v28, %v301_v33  ;;  %v2654_v47 = vld [vmem:[%s2559_s17 + $0xd0] sm:$0x3] }
  0x19   : > { %4073 = vst [vmem:[#allocation4_spill] sm:$0xff] %v2627_v31  ;;  %1850 = vrot.lane.b32.xlu1 %v2627_v31, %s2516_s18  ;;  %v304_v45 = vsel %vm274_vm0, %v301_v33, %v303_v34  ;;  %v280_v46 = vrot.slane %v2623_v30, 1  ;;  %v281_v50 = vrot.slane %v2633_v35, 1  ;;  %v2660_v51 = vld [vmem:[%s2559_s17 + $0xa8] sm:$0xff]  ;;  %v283_v53 = vrot.slane %v2636_v36, 1  ;;  %v2680_v62 = vld [vmem:[%s2559_s17 + $0x90] sm:$0xff] }
  0x1a   : > { %v292_v48 = vsel %vm274_vm0, %v290_v38, %v291_v39  ;;  %v294_v49 = vsel %vm274_vm0, %v291_v39, %v293_v40  ;;  %1840 = vrot.lane.b32.xlu0 %v1839_v43, %s2516_s18  ;;  %v2663_v52 = vpack.i.bf16 %v304_v45, %v302_v44  ;;  %v315_v54 = vrot.slane %v2643_v41, 1  ;;  %v2672_v57 = vld [vmem:[%s2559_s17 + $0xb8] sm:$0x3]  ;;  %v2686_v3 = vld [vmem:[%s2559_s17 + $0xa0] sm:$0x3]  ;;  %v2701_v22 = vld [vmem:[%s2559_s17 + $0x108] sm:$0xff] }
  0x1b   : > { %v316_v55 = vrot.slane %v2646_v42, 1  ;;  %v282_v58 = vsel %vm274_vm0, %v280_v46, %v281_v50  ;;  %v318_v59 = vrot.slane %v2654_v47, 1  ;;  %v2676_v60 = vpack.i.bf16 %v294_v49, %v292_v48  ;;  %v2683_v63 = vld [vmem:[%s2559_s17 + $0x98] sm:$0xff]  ;;  %v2704_v26 = vld [vmem:[%s2559_s17 + $0x110] sm:$0xff]  ;;  %v2726_v40 = vld [vmem:[%s2559_s17 + $0x100] sm:$0x3] }
  0x1c   : > { %4074 = vst [vmem:[#allocation5_spill] sm:$0xff] %v2663_v52  ;;  %v284_v61 = vsel %vm274_vm0, %v281_v50, %v283_v53  ;;  %v310_v4 = vrot.slane %v2660_v51, 1  ;;  %v311_v5 = vrot.slane %v2669_v56, 1  ;;  %v313_v9 = vrot.slane %v2672_v57, 1  ;;  %v2709_v27 = vld [vmem:[%s2559_s17 + $0x118] sm:$0x3] }
  0x1d   : > { %4075 = vst [vmem:[#allocation6_spill] sm:$0xff] %v2676_v60  ;;  %v2693_v10 = vpack.i.bf16 %v284_v61, %v282_v58  ;;  %v317_v13 = vsel %vm274_vm0, %v315_v54, %v316_v55  ;;  %v319_v14 = vsel %vm274_vm0, %v316_v55, %v318_v59  ;;  %v305_v15 = vrot.slane %v2680_v62, 1  ;;  %v2720_v38 = vld [vmem:[%s2559_s17 + $0xf0] sm:$0xff]  ;;  %v2723_v39 = vld [vmem:[%s2559_s17 + $0xf8] sm:$0xff]  ;;  %v2737_v49 = vld [vmem:[%s2559_s17 + $0xe0] sm:$0xff] }
  0x1e   : > { %v306_v20 = vrot.slane %v2683_v63, 1  ;;  %v308_v21 = vrot.slane %v2686_v3, 1  ;;  %v312_v28 = vsel %vm274_vm0, %v310_v4, %v311_v5  ;;  %v314_v32 = vsel %vm274_vm0, %v311_v5, %v313_v9  ;;  %v2734_v48 = vld [vmem:[%s2559_s17 + $0xd8] sm:$0xff]  ;;  %v2740_v50 = vld [vmem:[%s2559_s17 + $0xe8] sm:$0x3] }
  0x1f   : > { %1865 = vrot.lane.b32.xlu2 %v2663_v52, %s2516_s18  ;;  %4076 = vst [vmem:[#allocation7_spill] sm:$0xff] %v2693_v10  ;;  %v2715_v33 = vpack.i.bf16 %v319_v14, %v317_v13  ;;  %v330_v34 = vrot.slane %v2701_v22, 1  ;;  %v331_v37 = vrot.slane %v2704_v26, 1  ;;  %v333_v45 = vrot.slane %v2709_v27, 1  ;;  %v2755_v13 = vld [vmem:[%s2559_s17 + $0x150] sm:$0xff]  ;;  %v2758_v14 = vld [vmem:[%s2559_s17 + $0x158] sm:$0xff] }
  0x20   : > { %v307_v43 = vsel %vm274_vm0, %v305_v15, %v306_v20  ;;  %v309_v44 = vsel %vm274_vm0, %v306_v20, %v308_v21  ;;  %v2731_v46 = vpack.i.bf16 %v314_v32, %v312_v28  ;;  %v325_v53 = vrot.slane %v2720_v38, 1  ;;  %4080 = vst [vmem:[#allocation11_spill] sm:$0xff] %v2755_v13  ;;  %v2763_v15 = vld [vmem:[%s2559_s17 + $0x160] sm:$0x3] }
  0x21   : > { %1855 = vrot.lane.b32.xlu1 %v2676_v60, %s2516_s18  ;;  %4077 = vst [vmem:[#allocation8_spill] sm:$0xff] %v2715_v33  ;;  %v326_v54 = vrot.slane %v2723_v39, 1  ;;  %v328_v55 = vrot.slane %v2726_v40, 1  ;;  %v2747_v58 = vpack.i.bf16 %v309_v44, %v307_v43  ;;  %v332_v59 = vsel %vm274_vm0, %v330_v34, %v331_v37  ;;  %v2777_v43 = vld [vmem:[%s2559_s17 + $0x140] sm:$0xff]  ;;  %v2780_v44 = vld [vmem:[%s2559_s17 + $0x148] sm:$0x3] }
  0x22   : > { %1845 = vrot.lane.b32.xlu0 %v2693_v10, %s2516_s18  ;;  %4078 = vst [vmem:[#allocation9_spill] sm:$0xff] %v2731_v46  ;;  %v334_v61 = vsel %vm274_vm0, %v331_v37, %v333_v45  ;;  %v320_v4 = vrot.slane %v2734_v48, 1  ;;  %v321_v5 = vrot.slane %v2737_v49, 1  ;;  %v323_v9 = vrot.slane %v2740_v50, 1  ;;  %v2774_v37 = vld [vmem:[%s2559_s17 + $0x138] sm:$0xff] }
  0x23   : > { %4079 = vst [vmem:[#allocation10_spill] sm:$0xff] %v2747_v58  ;;  %v327_v20 = vsel %vm274_vm0, %v325_v53, %v326_v54  ;;  %v329_v21 = vsel %vm274_vm0, %v326_v54, %v328_v55  ;;  %v2769_v28 = vpack.i.bf16 %v334_v61, %v332_v59  ;;  %v345_v32 = vrot.slane %v2755_v13, 1  ;;  %v2788_v59 = vld [vmem:[%s2559_s17 + $0x120] sm:$0xff]  ;;  %v2791_v61 = vld [vmem:[%s2559_s17 + $0x128] sm:$0xff] }
  0x24   : > { %4081 = vst [vmem:[#allocation12_spill] sm:$0xff] %v2758_v14  ;;  %v346_v34 = vrot.slane %v2758_v14, 1  ;;  %v322_v45 = vsel %vm274_vm0, %v320_v4, %v321_v5  ;;  %v324_v53 = vsel %vm274_vm0, %v321_v5, %v323_v9  ;;  %v348_v54 = vrot.slane %v2763_v15, 1 }
  0x25   : > { %4082 = vst [vmem:[#allocation13_spill] sm:$0xff] %v2769_v28  ;;  %v2785_v55 = vpack.i.bf16 %v329_v21, %v327_v20  ;;  %v341_v19 = vrot.slane %v2777_v43, 1  ;;  %v343_v52 = vrot.slane %v2780_v44, 1  ;;  %v2801_v4 = vpack.i.bf16 %v324_v53, %v322_v45 }
  0x26   : > { %v347_v5 = vsel %vm274_vm0, %v345_v32, %v346_v34  ;;  %v349_v9 = vsel %vm274_vm0, %v346_v34, %v348_v54  ;;  %v335_v20 = vrot.slane %v2788_v59, 1  ;;  %v336_v21 = vrot.slane %v2791_v61, 1 }
  0x27   : > { %1880 = vrot.lane.b32.xlu2 %v2715_v33, %s2516_s18  ;;  %4083 = vst [vmem:[#allocation14_spill] sm:$0xff] %v2785_v55  ;;  %v340_v33 = vrot.slane %v2774_v37, 1  ;;  %v344_v45 = vsel %vm274_vm0, %v341_v19, %v343_v52  ;;  %v2814_v32 = vpack.i.bf16 %v349_v9, %v347_v5  ;;  %v457_v34 = vrot.slane %v2623_v30, 2  ;;  %v2830_v52 = vld [vmem:[%s2559_s17 + $0x178] sm:$0x3] }
  0x28   : > { %4084 = vst [vmem:[#allocation15_spill] sm:$0xff] %v2801_v4  ;;  %v458_v53 = vrot.slane %v2633_v35, 2  ;;  %v337_v54 = vsel %vm274_vm0, %v335_v20, %v336_v21  ;;  %v455_v5 = vrot.slane %v2594_v16, 2  ;;  %v452_v9 = vrot.slane %v2585_v11, 2 }
  0x29   : > { %1875 = vrot.lane.b32.xlu1 %v2731_v46, %s2516_s18  ;;  %v2794_v46 = vld [vmem:[%s2559_s17 + $0x130] sm:$0x3]  ;;  %4085 = vst [vmem:[#allocation16_spill] sm:$0xff] %v2814_v32 }
  0x2a   : > { %1870 = vrot.lane.b32.xlu0 %v2747_v58, %s2516_s18  ;;  %v338_v58 = vrot.slane %v2794_v46, 1 }
  0x2c   : > { %v339_v10 = vsel %vm274_vm0, %v336_v21, %v338_v58 }
  0x2d   : > { %v2837_v58 = vpack.i.bf16 %v339_v10, %v337_v54  ;;  %v475_v10 = vrot.slane %v2568_v2, 2  ;;  %v472_v54 = vrot.slane %v2562_v0, 2  ;;  %v470_v2 = vrot.slane %v2620_v29, 2 }
  0x2f   : > { %1895 = vrot.lane.b32.xlu2 %v2769_v28, %s2516_s18  ;;  %v342_v28 = vsel %vm274_vm0, %v340_v33, %v341_v19  ;;  %v2824_v33 = vld [vmem:[%s2559_s17 + $0x168] sm:$0xff]  ;;  %v2827_v19 = vld [vmem:[%s2559_s17 + $0x170] sm:$0xff]  ;;  %4087 = vst [vmem:[#allocation18_spill] sm:$0xff] %v2837_v58 }
  0x30   : > { %v2821_v31 = vpack.i.bf16 %v344_v45, %v342_v28  ;;  %v350_v20 = vrot.slane %v2824_v33, 1  ;;  %v351_v21 = vrot.slane %v2827_v19, 1  ;;  %v353_v45 = vrot.slane %v2830_v52, 1 }
  0x31   : > { %1890 = vrot.lane.b32.xlu1 %v2785_v55, %s2516_s18  ;;  %v460_v55 = vrot.slane %v2636_v36, 2  ;;  %v459_v36 = vsel %vm451_vm1, %v457_v34, %v458_v53 }
  0x32   : > { %1885 = vrot.lane.b32.xlu0 %v2801_v4, %s2516_s18  ;;  %4086 = vst [vmem:[#allocation17_spill] sm:$0xff] %v2821_v31  ;;  %v453_v4 = vrot.slane %v2588_v12, 2 }
  0x33   : > { %v461_v28 = vsel %vm451_vm1, %v458_v53, %v460_v55  ;;  %v352_v55 = vsel %vm274_vm0, %v350_v20, %v351_v21  ;;  %v354_v53 = vsel %vm274_vm0, %v351_v21, %v353_v45  ;;  %v463_v21 = vrot.slane %v2577_v7, 2 }
  0x34   : > { %v454_v16 = vsel %vm451_vm1, %v452_v9, %v453_v4  ;;  %v456_v11 = vsel %vm451_vm1, %v453_v4, %v455_v5  ;;  %v2851_v34 = vpack.i.bf16 %v461_v28, %v459_v36  ;;  %v467_v9 = vrot.slane %v2611_v24, 2 }
  0x35   : > { %v468_v4 = vrot.slane %v2614_v25, 2  ;;  %v465_v5 = vrot.slane %v2580_v8, 2  ;;  %v2863_v36 = vpack.i.bf16 %v354_v53, %v352_v55  ;;  %v490_v53 = vrot.slane %v2672_v57, 2 }
  0x36   : > { %v478_v57 = vrot.slane %v2600_v18, 2 }
  0x37   : > { %1910 = vrot.lane.b32.xlu2 %v2814_v32, %s2516_s18  ;;  %v473_v32 = vrot.slane %v2565_v1, 2  ;;  %4088 = vst [vmem:[#allocation19_spill] sm:$0xff] %v2863_v36  ;;  %v469_v29 = vsel %vm451_vm1, %v467_v9, %v468_v4  ;;  %v471_v8 = vsel %vm451_vm1, %v468_v4, %v470_v2  ;;  %v483_v9 = vrot.slane %v2683_v63, 2 }
  0x38   : > { %v485_v4 = vrot.slane %v2686_v3, 2 }
  0x39   : > { %1905 = vrot.lane.b32.xlu1 %v2821_v31, %s2516_s18  ;;  %v1919_v31 = vpack.i.bf16 %v456_v11, %v454_v16  ;;  %v474_v28 = vsel %vm451_vm1, %v472_v54, %v473_v32  ;;  %v476_v20 = vsel %vm451_vm1, %v473_v32, %v475_v10  ;;  %v462_v11 = vrot.slane %v2574_v6, 2 }
  0x3a   : > { %1900 = vrot.lane.b32.xlu0 %v2837_v58, %s2516_s18  ;;  %v2874_v45 = vpack.i.bf16 %v476_v20, %v474_v28  ;;  %v487_v16 = vrot.slane %v2660_v51, 2  ;;  %v466_v32 = vsel %vm451_vm1, %v463_v21, %v465_v5  ;;  %v488_v10 = vrot.slane %v2669_v56, 2 }
  0x3b   : > { %v464_v55 = vsel %vm451_vm1, %v462_v11, %v463_v21  ;;  %v482_v54 = vrot.slane %v2680_v62, 2  ;;  %v477_v28 = vrot.slane %v2597_v17, 2  ;;  %v480_v11 = vrot.slane %v2608_v23, 2 }
  0x3c   : > { %v2888_v2 = vpack.i.bf16 %v466_v32, %v464_v55  ;;  %v489_v5 = vsel %vm451_vm1, %v487_v16, %v488_v10  ;;  %v491_v20 = vsel %vm451_vm1, %v488_v10, %v490_v53  ;;  %v486_v21 = vsel %vm451_vm1, %v483_v9, %v485_v4 }
  0x3d   : > { %v484_v3 = vsel %vm451_vm1, %v482_v54, %v483_v9  ;;  %v503_v16 = vrot.slane %v2723_v39, 2  ;;  %v479_v55 = vsel %vm451_vm1, %v477_v28, %v478_v57  ;;  %v481_v23 = vsel %vm451_vm1, %v478_v57, %v480_v11 }
  0x3e   : > { %v505_v32 = vrot.slane %v2726_v40, 2  ;;  %v2908_v10 = vpack.i.bf16 %v486_v21, %v484_v3  ;;  %v497_v53 = vrot.slane %v2734_v48, 2  ;;  %v498_v54 = vrot.slane %v2737_v49, 2 }
  0x3f   : > { %1925 = vrot.lane.b32.xlu2 %v2851_v34, %s2517_s19  ;;  %v500_v9 = vrot.slane %v2740_v50, 2  ;;  %v2915_v4 = vpack.i.bf16 %v481_v23, %v479_v55  ;;  %v493_v40 = vrot.slane %v2646_v42, 2  ;;  %v495_v57 = vrot.slane %v2654_v47, 2 }
  0x40   : > { %v506_v28 = vsel %vm451_vm1, %v503_v16, %v505_v32  ;;  %v499_v50 = vsel %vm451_vm1, %v497_v53, %v498_v54  ;;  %v517_v21 = vrot.slane %v2774_v37, 2  ;;  %v520_v55 = vrot.slane %v2780_v44, 2 }
  0x41   : > { %1920 = vrot.lane.b32.xlu1 %v1919_v31, %s2517_s19  ;;  %v2881_v31 = vpack.i.bf16 %v471_v8, %v469_v29  ;;  %v2901_v29 = vpack.i.bf16 %v491_v20, %v489_v5  ;;  %v502_v8 = vrot.slane %v2720_v38, 2  ;;  %v492_v20 = vrot.slane %v2643_v41, 2 }
  0x42   : > { %1915 = vrot.lane.b32.xlu0 %v2863_v36, %s2516_s18  ;;  %v501_v11 = vsel %vm451_vm1, %v498_v54, %v500_v9  ;;  %v496_v47 = vsel %vm451_vm1, %v493_v40, %v495_v57  ;;  %v512_v32 = vrot.slane %v2788_v59, 2  ;;  %v513_v53 = vrot.slane %v2791_v61, 2 }
  0x43   : > { %v504_v5 = vsel %vm451_vm1, %v502_v8, %v503_v16  ;;  %v518_v8 = vrot.slane %v2777_v43, 2  ;;  %v494_v16 = vsel %vm451_vm1, %v492_v20, %v493_v40  ;;  %v2935_v23 = vpack.i.bf16 %v501_v11, %v499_v50 }
  0x44   : > { %v2928_v3 = vpack.i.bf16 %v506_v28, %v504_v5  ;;  %v515_v54 = vrot.slane %v2794_v46, 2  ;;  %v2942_v9 = vpack.i.bf16 %v496_v47, %v494_v16  ;;  %v507_v20 = vrot.slane %v2701_v22, 2 }
  0x45   : > { %4089 = vst [vmem:[#allocation20_spill] sm:$0xff] %v2935_v23  ;;  %v519_v5 = vsel %vm451_vm1, %v517_v21, %v518_v8  ;;  %v521_v28 = vsel %vm451_vm1, %v518_v8, %v520_v55  ;;  %v508_v44 = vrot.slane %v2704_v26, 2  ;;  %v510_v40 = vrot.slane %v2709_v27, 2 }
  0x46   : > { %v514_v46 = vsel %vm451_vm1, %v512_v32, %v513_v53  ;;  %v516_v57 = vsel %vm451_vm1, %v513_v53, %v515_v54  ;;  %v2955_v50 = vpack.i.bf16 %v521_v28, %v519_v5  ;;  %v527_v27 = vrot.slane %v2824_v33, 2 }
  0x47   : > { %1940 = vrot.lane.b32.xlu2 %v2874_v45, %s2517_s19  ;;  %v509_v11 = vsel %vm451_vm1, %v507_v20, %v508_v44  ;;  %v511_v21 = vsel %vm451_vm1, %v508_v44, %v510_v40  ;;  %v2959_v8 = vpack.i.bf16 %v516_v57, %v514_v46  ;;  %v528_v16 = vrot.slane %v2827_v19, 2 }
  0x48   : > { %4090 = vst [vmem:[#allocation21_spill] sm:$0xff] %v2955_v50  ;;  %v530_v47 = vrot.slane %v2830_v52, 2  ;;  %v2966_v55 = vpack.i.bf16 %v511_v21, %v509_v11  ;;  %v522_v32 = vrot.slane %v2755_v13, 2  ;;  %v523_v53 = vrot.slane %v2758_v14, 2 }
  0x49   : > { %1935 = vrot.lane.b32.xlu1 %v2881_v31, %s2517_s19  ;;  %4091 = vst [vmem:[#allocation22_spill] sm:$0xff] %v2959_v8  ;;  %v525_v54 = vrot.slane %v2763_v15, 2  ;;  %v529_v5 = vsel %vm451_vm1, %v527_v27, %v528_v16  ;;  %v1999_v52 = vpack.i.bf16 %v2633_v35, %v2623_v30  ;;  %v2014_v46 = vpack.i.bf16 %v2565_v1, %v2562_v0 }
  0x4a   : > { %1930 = vrot.lane.b32.xlu0 %v2888_v2, %s2517_s19  ;;  %v531_v28 = vsel %vm451_vm1, %v528_v16, %v530_v47  ;;  %v524_v20 = vsel %vm451_vm1, %v522_v32, %v523_v53  ;;  %v2009_v57 = vpack.i.bf16 %v2614_v25, %v2611_v24  ;;  %v2004_v11 = vpack.i.bf16 %v2577_v7, %v2574_v6 }
  0x4b   : > { %v526_v44 = vsel %vm451_vm1, %v523_v53, %v525_v54  ;;  %v2981_v40 = vpack.i.bf16 %v531_v28, %v529_v5  ;;  %v2029_v27 = vpack.i.bf16 %v2669_v56, %v2660_v51  ;;  %v2024_v16 = vpack.i.bf16 %v2683_v63, %v2680_v62 }
  0x4c   : > { %v2984_v15 = vpack.i.bf16 %v526_v44, %v524_v20  ;;  %v2019_v47 = vpack.i.bf16 %v2600_v18, %v2597_v17  ;;  %v2044_v53 = vpack.i.bf16 %v2723_v39, %v2720_v38  ;;  %v2039_v54 = vpack.i.bf16 %v2737_v49, %v2734_v48 }
  0x4d   : > { %4092 = vst [vmem:[#allocation23_spill] sm:$0xff] %v2981_v40  ;;  %v2034_v5 = vpack.i.bf16 %v2646_v42, %v2643_v41  ;;  %v2054_v20 = vpack.i.bf16 %v2791_v61, %v2788_v59  ;;  %v2049_v44 = vpack.i.bf16 %v2704_v26, %v2701_v22 }
  0x4e   : > { %4093 = vst [vmem:[#allocation24_spill] sm:$0xff] %v2984_v15 }
  0x4f   : > { %1955 = vrot.lane.b32.xlu2 %v2901_v29, %s2517_s19 }
  0x51   : > { %1950 = vrot.lane.b32.xlu1 %v2908_v10, %s2517_s19 }
  0x52   : > { %1945 = vrot.lane.b32.xlu0 %v2915_v4, %s2517_s19 }
  0x57   : > { %1970 = vrot.lane.b32.xlu2 %v2928_v3, %s2517_s19 }
  0x59   : > { %1965 = vrot.lane.b32.xlu1 %v2935_v23, %s2517_s19 }
  0x5a   : > { %1960 = vrot.lane.b32.xlu0 %v2942_v9, %s2517_s19 }
  0x5f   : > { %1985 = vrot.lane.b32.xlu2 %v2955_v50, %s2517_s19 }
  0x61   : > { %1980 = vrot.lane.b32.xlu1 %v2959_v8, %s2517_s19 }
  0x62   : > { %1975 = vrot.lane.b32.xlu0 %v2966_v55, %s2517_s19 }
  0x67   : > { %2000 = vrot.lane.b32.xlu2 %v1999_v52, %s2518_s20  ;;  %v2059_v52 = vpack.i.bf16 %v2777_v43, %v2774_v37 }
  0x69   : > { %1995 = vrot.lane.b32.xlu1 %v2981_v40, %s2517_s19 }
  0x6a   : > { %1990 = vrot.lane.b32.xlu0 %v2984_v15, %s2517_s19 }
  0x6f   : > { %2015 = vrot.lane.b32.xlu2 %v2014_v46, %s2518_s20  ;;  %v3031_v46 = vld [vmem:[%s2559_s17 + $0x180] sm:$0xff] }
  0x71   : > { %2010 = vrot.lane.b32.xlu1 %v2009_v57, %s2518_s20  ;;  %v2998_v21 = vpop.permute.xlu2 %1860  ;;  %v3034_v57 = vld [vmem:[%s2559_s17 + $0x188] sm:$0xff] }
  0x72   : > { %2005 = vrot.lane.b32.xlu0 %v2004_v11, %s2518_s20  ;;  %v1862_v23 = vunpack.i.l.bf16 %v2998_v21 }
  0x77   : > { %2030 = vrot.lane.b32.xlu2 %v2029_v27, %s2518_s20 }
  0x79   : > { %2025 = vrot.lane.b32.xlu1 %v2024_v16, %s2518_s20  ;;  %v3009_v32 = vpop.permute.xlu2 %1865  ;;  %v3044_v16 = vpack.i.bf16 %v3034_v57, %v3031_v46 }
  0x7a   : > { %2020 = vrot.lane.b32.xlu0 %v2019_v47, %s2518_s20 }
  0x7b   : > { %4094 = vst [vmem:[#allocation25_spill] sm:$0xff] %v3044_v16 }
  0x7f   : > { %2045 = vrot.lane.b32.xlu2 %v2044_v53, %s2518_s20  ;;  %v2069_v53 = vpack.i.bf16 %v2827_v19, %v2824_v33 }
  0x81   : > { %2040 = vrot.lane.b32.xlu1 %v2039_v54, %s2518_s20  ;;  %v3020_v28 = vpop.permute.xlu2 %1880  ;;  %v2064_v54 = vpack.i.bf16 %v2758_v14, %v2755_v13 }
  0x82   : > { %2035 = vrot.lane.b32.xlu0 %v2034_v5, %s2518_s20 }
  0x87   : > { %2060 = vrot.lane.b32.xlu2 %v2059_v52, %s2518_s20 }
  0x89   : > { %2055 = vrot.lane.b32.xlu1 %v2054_v20, %s2518_s20  ;;  %v3037_v11 = vpop.permute.xlu2 %1895 }
  0x8a   : > { %2050 = vrot.lane.b32.xlu0 %v2049_v44, %s2518_s20 }
  0x8b   : > { %v3040_v27 = vpop.permute.xlu1 %1850 }
  0x8c   : > { %v3046_v47 = vpop.permute.xlu0 %1840 }
  0x8f   : > { %2075 = vrot.lane.b32.xlu2 %v3044_v16, %s2518_s20  ;;  %v4095_v16 = vld [vmem:[#allocation4_spill] sm:$0xff] }
  0x91   : > { %2070 = vrot.lane.b32.xlu1 %v2069_v53, %s2518_s20  ;;  %v3055_v5 = vpop.permute.xlu2 %1910 }
  0x92   : > { %2065 = vrot.lane.b32.xlu0 %v2064_v54, %s2518_s20 }
  0x93   : > { %v3058_v52 = vpop.permute.xlu1 %1855 }
  0x94   : > { %v1846_v20 = vpop.permute.xlu0 %1845 }
  0x95   : > { %v1848_v44 = vunpack.i.h.bf16 %v1846_v20  ;;  %v1847_v40 = vunpack.i.l.bf16 %v1846_v20  ;;  %v4096_v20 = vld [vmem:[#allocation7_spill] sm:$0xff] }
  0x97   : > { %2090 = vrot.lane.b32.xlu2 %v2676_v60, %s2519_s21  ;;  %v1234_v54 = vsel %vm1230_vm3, %v2633_v35, %v1848_v44  ;;  %v1233_v15 = vsel %vm1230_vm3, %v2623_v30, %v1847_v40  ;;  %v4099_v35 = vld [vmem:[#allocation10_spill] sm:$0xff]  ;;  %v4100_v30 = vld [vmem:[#allocation5_spill] sm:$0xff] }
  0x99   : > { %2085 = vrot.lane.b32.xlu1 %v4095_v16, %s2519_s21  ;;  %v1926_v8 = vpop.permute.xlu2 %1925 }
  0x9a   : > { %v1928_v53 = vunpack.i.h.bf16 %v1926_v8  ;;  %v1927_v50 = vunpack.i.l.bf16 %v1926_v8  ;;  %2080 = vrot.lane.b32.xlu0 %v4096_v20, %s2519_s21  ;;  %v1863_v8 = vunpack.i.h.bf16 %v2998_v21 }
  0x9b   : > { %v1876_v13 = vpop.permute.xlu1 %1875 }
  0x9c   : > { %v3071_v60 = vsel %vm1263_vm2, %v1233_v15, %v1927_v50  ;;  %v3074_v16 = vsel %vm1263_vm2, %v1234_v54, %v1928_v53  ;;  %v3076_v14 = vpop.permute.xlu0 %1870  ;;  %v1240_v50 = vsel %vm1230_vm3, %v2565_v1, %v1863_v8  ;;  %v1239_v15 = vsel %vm1230_vm3, %v2562_v0, %v1862_v23  ;;  %v4101_v53 = vld [vmem:[#allocation3_spill] sm:$0xff]  ;;  %v4105_v1 = vld [vmem:[#allocation8_spill] sm:$0xff] }
  0x9d   : > { %4097 = vst [vmem:[#allocation7_spill] sm:$0xff] %v3071_v60  ;;  %v4104_v60 = vld [vmem:[#allocation15_spill] sm:$0xff] }
  0x9e   : > { %4098 = vst [vmem:[#allocation26_spill] sm:$0xff] %v3074_v16  ;;  %v1878_v16 = vunpack.i.h.bf16 %v1876_v13 }
  0x9f   : > { %2105 = vrot.lane.b32.xlu2 %v4099_v35, %s2519_s21 }
  0xa1   : > { %2100 = vrot.lane.b32.xlu1 %v4100_v30, %s2519_s21  ;;  %v1941_v40 = vpop.permute.xlu2 %1940 }
  0xa2   : > { %v1943_v44 = vunpack.i.h.bf16 %v1941_v40  ;;  %v1942_v20 = vunpack.i.l.bf16 %v1941_v40  ;;  %2095 = vrot.lane.b32.xlu0 %v4101_v53, %s2519_s21  ;;  %v1877_v40 = vunpack.i.l.bf16 %v1876_v13 }
  0xa3   : > { %v1891_v54 = vpop.permute.xlu1 %1890 }
  0xa4   : > { %v3091_v21 = vsel %vm1263_vm2, %v1240_v50, %v1943_v44  ;;  %v3094_v35 = vsel %vm1263_vm2, %v1239_v15, %v1942_v20  ;;  %v3096_v30 = vpop.permute.xlu0 %1885  ;;  %v1246_v44 = vsel %vm1230_vm3, %v2669_v56, %v1878_v16  ;;  %v1245_v20 = vsel %vm1230_vm3, %v2660_v51, %v1877_v40  ;;  %v4106_v50 = vld [vmem:[#allocation9_spill] sm:$0xff] }
  0xa5   : > { %4102 = vst [vmem:[#allocation27_spill] sm:$0xff] %v3091_v21  ;;  %v1843_v51 = vunpack.i.h.bf16 %v3046_v47  ;;  %v1842_v56 = vunpack.i.l.bf16 %v3046_v47  ;;  %v4109_v16 = vld [vmem:[#allocation13_spill] sm:$0xff] }
  0xa6   : > { %4103 = vst [vmem:[#allocation28_spill] sm:$0xff] %v3094_v35 }
  0xa7   : > { %2120 = vrot.lane.b32.xlu2 %v4104_v60, %s2519_s21 }
  0xa9   : > { %2115 = vrot.lane.b32.xlu1 %v4105_v1, %s2519_s21  ;;  %v1956_v0 = vpop.permute.xlu2 %1955  ;;  %v1893_v1 = vunpack.i.h.bf16 %v1891_v54 }
  0xaa   : > { %v1958_v23 = vunpack.i.h.bf16 %v1956_v0  ;;  %v1957_v8 = vunpack.i.l.bf16 %v1956_v0  ;;  %2110 = vrot.lane.b32.xlu0 %v4106_v50, %s2519_s21  ;;  %v1892_v0 = vunpack.i.l.bf16 %v1891_v54 }
  0xab   : > { %v1906_v15 = vpop.permute.xlu1 %1905 }
  0xac   : > { %v3109_v13 = vsel %vm1263_vm2, %v1246_v44, %v1958_v23  ;;  %v3112_v60 = vsel %vm1263_vm2, %v1245_v20, %v1957_v8  ;;  %v3114_v53 = vpop.permute.xlu0 %1900  ;;  %v1252_v8 = vsel %vm1230_vm3, %v2723_v39, %v1893_v1  ;;  %v1251_v54 = vsel %vm1230_vm3, %v2720_v38, %v1892_v0  ;;  %v4110_v20 = vld [vmem:[#allocation14_spill] sm:$0xff] }
  0xad   : > { %4107 = vst [vmem:[#allocation29_spill] sm:$0xff] %v3109_v13  ;;  %v3135_v13 = vld [vmem:[%s2559_s17 + $0x190] sm:$0x3]  ;;  %v1232_v39 = vsel %vm1230_vm3, %v2588_v12, %v1843_v51  ;;  %v4113_v1 = vld [vmem:[#allocation2_spill] sm:$0xff]  ;;  %v1853_v51 = vunpack.i.h.bf16 %v3040_v27 }
  0xae   : > { %4108 = vst [vmem:[#allocation30_spill] sm:$0xff] %v3112_v60  ;;  %v1231_v38 = vsel %vm1230_vm3, %v4113_v1, %v1842_v56  ;;  %v730_v12 = vrot.slane %v3135_v13, 1  ;;  %v1858_v56 = vunpack.i.h.bf16 %v3058_v52  ;;  %v1857_v1 = vunpack.i.l.bf16 %v3058_v52 }
  0xaf   : > { %2135 = vrot.lane.b32.xlu2 %v2837_v58, %s2519_s21 }
  0xb1   : > { %2130 = vrot.lane.b32.xlu1 %v4109_v16, %s2519_s21  ;;  %v1971_v40 = vpop.permute.xlu2 %1970 }
  0xb2   : > { %v1973_v23 = vunpack.i.h.bf16 %v1971_v40  ;;  %v1972_v44 = vunpack.i.l.bf16 %v1971_v40  ;;  %2125 = vrot.lane.b32.xlu0 %v4110_v20, %s2519_s21 }
  0xb3   : > { %v1921_v58 = vpop.permute.xlu1 %1920 }
  0xb4   : > { %v3129_v50 = vsel %vm1263_vm2, %v1252_v8, %v1973_v23  ;;  %v3132_v47 = vsel %vm1263_vm2, %v1251_v54, %v1972_v44  ;;  %v1923_v16 = vunpack.i.h.bf16 %v1921_v58  ;;  %v1922_v60 = vunpack.i.l.bf16 %v1921_v58  ;;  %v3141_v0 = vpop.permute.xlu0 %1915 }
  0xb5   : > { %4111 = vst [vmem:[#allocation31_spill] sm:$0xff] %v3129_v50  ;;  %v727_v8 = vrot.slane %v3031_v46, 1  ;;  %v1908_v44 = vunpack.i.h.bf16 %v1906_v15  ;;  %v1907_v54 = vunpack.i.l.bf16 %v1906_v15  ;;  %v728_v58 = vrot.slane %v3034_v57, 1 }
  0xb6   : > { %4112 = vst [vmem:[#allocation32_spill] sm:$0xff] %v3132_v47  ;;  %v1264_v40 = vsel %vm1263_vm2, %v1231_v38, %v1922_v60  ;;  %v1265_v23 = vsel %vm1263_vm2, %v1232_v39, %v1923_v16  ;;  %v4114_v60 = vld [vmem:[#allocation16_spill] sm:$0xff]  ;;  %v1852_v39 = vunpack.i.l.bf16 %v3040_v27  ;;  %v4115_v47 = vld [vmem:[#allocation17_spill] sm:$0xff] }
  0xb7   : > { %2150 = vrot.lane.b32.xlu2 %v2863_v36, %s2519_s21  ;;  %v1258_v36 = vsel %vm1230_vm3, %v2777_v43, %v1908_v44  ;;  %v1257_v20 = vsel %vm1230_vm3, %v2774_v37, %v1907_v54  ;;  %v729_v52 = vsel %vm274_vm0, %v727_v8, %v728_v58  ;;  %v731_v35 = vsel %vm274_vm0, %v728_v58, %v730_v12 }
  0xb8   : > { %v1238_v43 = vsel %vm1230_vm3, %v2614_v25, %v1858_v56  ;;  %v1237_v37 = vsel %vm1230_vm3, %v2611_v24, %v1857_v1  ;;  %v3182_v25 = vpack.i.bf16 %v731_v35, %v729_v52  ;;  %v1872_v56 = vunpack.i.l.bf16 %v3076_v14 }
  0xb9   : > { %2145 = vrot.lane.b32.xlu1 %v4114_v60, %s2519_s21  ;;  %v1986_v16 = vpop.permute.xlu2 %1985  ;;  %v1868_v35 = vunpack.i.h.bf16 %v3009_v32  ;;  %v1867_v1 = vunpack.i.l.bf16 %v3009_v32 }
  0xba   : > { %v1988_v15 = vunpack.i.h.bf16 %v1986_v16  ;;  %v1987_v38 = vunpack.i.l.bf16 %v1986_v16  ;;  %2140 = vrot.lane.b32.xlu0 %v4115_v47, %s2519_s21 }
  0xbb   : > { %v1936_v50 = vpop.permute.xlu1 %1935 }
  0xbc   : > { %v3165_v60 = vsel %vm1263_vm2, %v1258_v36, %v1988_v15  ;;  %v3168_v27 = vsel %vm1263_vm2, %v1257_v20, %v1987_v38  ;;  %v1938_v16 = vunpack.i.h.bf16 %v1936_v50  ;;  %v1937_v21 = vunpack.i.l.bf16 %v1936_v50  ;;  %v1931_v44 = vpop.permute.xlu0 %1930 }
  0xbd   : > { %v1933_v58 = vunpack.i.h.bf16 %v1931_v44  ;;  %v1932_v12 = vunpack.i.l.bf16 %v1931_v44  ;;  %v1236_v36 = vsel %vm1230_vm3, %v2577_v7, %v1853_v51  ;;  %v1235_v20 = vsel %vm1230_vm3, %v2574_v6, %v1852_v39 }
  0xbe   : > { %v1271_v54 = vsel %vm1263_vm2, %v1238_v43, %v1938_v16  ;;  %v1270_v8 = vsel %vm1263_vm2, %v1237_v37, %v1937_v21  ;;  %v1873_v21 = vunpack.i.h.bf16 %v3076_v14  ;;  %v1243_v16 = vsel %vm1230_vm3, %v2680_v62, %v1872_v56 }
  0xbf   : > { %2165 = vrot.lane.b32.xlu2 %v2888_v2, %s2520_s22  ;;  %v3185_v24 = vsel %vm1263_vm2, %v1236_v36, %v1933_v58  ;;  %v3188_v50 = vsel %vm1263_vm2, %v1235_v20, %v1932_v12  ;;  %v1888_v12 = vunpack.i.h.bf16 %v3096_v30  ;;  %v1887_v36 = vunpack.i.l.bf16 %v3096_v30 }
  0xc0   : > { %v1244_v52 = vsel %vm1230_vm3, %v2683_v63, %v1873_v21  ;;  %v1882_v56 = vunpack.i.l.bf16 %v3020_v28 }
  0xc1   : > { %2160 = vrot.lane.b32.xlu1 %v2851_v34, %s2520_s22  ;;  %v2001_v6 = vpop.permute.xlu2 %2000 }
  0xc2   : > { %v2003_v7 = vunpack.i.h.bf16 %v2001_v6  ;;  %v2002_v51 = vunpack.i.l.bf16 %v2001_v6  ;;  %2155 = vrot.lane.b32.xlu0 %v3182_v25, %s2519_s21 }
  0xc3   : > { %v1951_v39 = vpop.permute.xlu1 %1950 }
  0xc4   : > { %v3199_v15 = vsel %vm1296_vm4, %v1264_v40, %v2002_v51  ;;  %v3202_v14 = vsel %vm1296_vm4, %v1265_v23, %v2003_v7  ;;  %v1953_v38 = vunpack.i.h.bf16 %v1951_v39  ;;  %v1952_v34 = vunpack.i.l.bf16 %v1951_v39  ;;  %v1946_v43 = vpop.permute.xlu0 %1945 }
  0xc5   : > { %v1948_v44 = vunpack.i.h.bf16 %v1946_v43  ;;  %v1947_v58 = vunpack.i.l.bf16 %v1946_v43  ;;  %v1242_v40 = vsel %vm1230_vm3, %v2600_v18, %v1868_v35  ;;  %v1241_v23 = vsel %vm1230_vm3, %v2597_v17, %v1867_v1 }
  0xc6   : > { %v1276_v32 = vsel %vm1263_vm2, %v1243_v16, %v1952_v34  ;;  %v1277_v37 = vsel %vm1263_vm2, %v1244_v52, %v1953_v38  ;;  %v1883_v17 = vunpack.i.h.bf16 %v3020_v28  ;;  %v1250_v1 = vsel %vm1230_vm3, %v2737_v49, %v1888_v12 }
  0xc7   : > { %2180 = vrot.lane.b32.xlu2 %v2915_v4, %s2520_s22  ;;  %v3217_v63 = vsel %vm1263_vm2, %v1242_v40, %v1948_v44  ;;  %v3220_v62 = vsel %vm1263_vm2, %v1241_v23, %v1947_v58  ;;  %v1249_v39 = vsel %vm1230_vm3, %v2734_v48, %v1887_v36  ;;  %v1898_v43 = vunpack.i.h.bf16 %v3037_v11 }
  0xc8   : > { %v1903_v44 = vunpack.i.h.bf16 %v3114_v53  ;;  %v1902_v58 = vunpack.i.l.bf16 %v3114_v53  ;;  %v1897_v23 = vunpack.i.l.bf16 %v3037_v11 }
  0xc9   : > { %2175 = vrot.lane.b32.xlu1 %v2874_v45, %s2520_s22  ;;  %v2016_v18 = vpop.permute.xlu2 %2015 }
  0xca   : > { %v2018_v20 = vunpack.i.h.bf16 %v2016_v18  ;;  %v2017_v21 = vunpack.i.l.bf16 %v2016_v18  ;;  %2170 = vrot.lane.b32.xlu0 %v2881_v31, %s2520_s22  ;;  %v1255_v11 = vsel %vm1230_vm3, %v2788_v59, %v1902_v58 }
  0xcb   : > { %v1966_v6 = vpop.permute.xlu1 %1965 }
  0xcc   : > { %v3231_v7 = vsel %vm1296_vm4, %v1270_v8, %v2017_v21  ;;  %v3234_v51 = vsel %vm1296_vm4, %v1271_v54, %v2018_v20  ;;  %v1968_v30 = vunpack.i.h.bf16 %v1966_v6  ;;  %v1967_v35 = vunpack.i.l.bf16 %v1966_v6  ;;  %v1961_v38 = vpop.permute.xlu0 %1960 }
  0xcd   : > { %v1963_v52 = vunpack.i.h.bf16 %v1961_v38  ;;  %v1962_v16 = vunpack.i.l.bf16 %v1961_v38  ;;  %v1248_v8 = vsel %vm1230_vm3, %v2646_v42, %v1883_v17  ;;  %v1247_v54 = vsel %vm1230_vm3, %v2643_v41, %v1882_v56 }
  0xce   : > { %v1282_v28 = vsel %vm1263_vm2, %v1249_v39, %v1967_v35  ;;  %v1283_v34 = vsel %vm1263_vm2, %v1250_v1, %v1968_v30  ;;  %v1254_v21 = vsel %vm1230_vm3, %v2704_v26, %v1898_v43  ;;  %v1256_v17 = vsel %vm1230_vm3, %v2791_v61, %v1903_v44 }
  0xcf   : > { %2195 = vrot.lane.b32.xlu2 %v2942_v9, %s2520_s22  ;;  %v3249_v49 = vsel %vm1263_vm2, %v1248_v8, %v1963_v52  ;;  %v3252_v48 = vsel %vm1263_vm2, %v1247_v54, %v1962_v16  ;;  %v1918_v1 = vunpack.i.h.bf16 %v3141_v0  ;;  %v1917_v26 = vunpack.i.l.bf16 %v3141_v0  ;;  %v4116_v54 = vld [vmem:[#allocation20_spill] sm:$0xff] }
  0xd0   : > { %v1913_v38 = vunpack.i.h.bf16 %v3055_v5  ;;  %v1912_v16 = vunpack.i.l.bf16 %v3055_v5  ;;  %v828_v5 = vrot.slane %v3031_v46, 2  ;;  %v4119_v46 = vld [vmem:[#allocation24_spill] sm:$0xff] }
  0xd1   : > { %2190 = vrot.lane.b32.xlu1 %v2901_v29, %s2520_s22  ;;  %v2031_v42 = vpop.permute.xlu2 %2030  ;;  %v1262_v0 = vsel %vm1230_vm3, %v2827_v19, %v1918_v1  ;;  %v1261_v8 = vsel %vm1230_vm3, %v2824_v33, %v1917_v26  ;;  %v829_v19 = vrot.slane %v3034_v57, 2  ;;  %v4121_v26 = vld [vmem:[#allocation22_spill] sm:$0xff] }
  0xd2   : > { %v2033_v41 = vunpack.i.h.bf16 %v2031_v42  ;;  %v2032_v40 = vunpack.i.l.bf16 %v2031_v42  ;;  %2185 = vrot.lane.b32.xlu0 %v2908_v10, %s2520_s22 }
  0xd3   : > { %v1981_v12 = vpop.permute.xlu1 %1980 }
  0xd4   : > { %v3263_v36 = vsel %vm1296_vm4, %v1276_v32, %v2032_v40  ;;  %v3266_v18 = vsel %vm1296_vm4, %v1277_v37, %v2033_v41  ;;  %v1983_v20 = vunpack.i.h.bf16 %v1981_v12  ;;  %v1982_v53 = vunpack.i.l.bf16 %v1981_v12  ;;  %v1976_v56 = vpop.permute.xlu0 %1975 }
  0xd5   : > { %v1978_v30 = vunpack.i.h.bf16 %v1976_v56  ;;  %v1977_v35 = vunpack.i.l.bf16 %v1976_v56  ;;  %v1253_v37 = vsel %vm1230_vm3, %v2701_v22, %v1897_v23  ;;  %v831_v23 = vrot.slane %v3135_v13, 2 }
  0xd6   : > { %v1288_v6 = vsel %vm1263_vm2, %v1255_v11, %v1982_v53  ;;  %v1289_v32 = vsel %vm1263_vm2, %v1256_v17, %v1983_v20  ;;  %v4117_v53 = vld [vmem:[#allocation12_spill] sm:$0xff]  ;;  %v4120_v11 = vld [vmem:[#allocation21_spill] sm:$0xff] }
  0xd7   : > { %2210 = vrot.lane.b32.xlu2 %v2966_v55, %s2520_s22  ;;  %v3283_v61 = vsel %vm1263_vm2, %v1254_v21, %v1978_v30  ;;  %v3286_v59 = vsel %vm1263_vm2, %v1253_v37, %v1977_v35  ;;  %v4118_v21 = vld [vmem:[#allocation11_spill] sm:$0xff]  ;;  %v830_v37 = vsel %vm451_vm1, %v828_v5, %v829_v19  ;;  %v832_v1 = vsel %vm451_vm1, %v829_v19, %v831_v23 }
  0xd8   : > { %v1259_v17 = vsel %vm1230_vm3, %v4118_v21, %v1912_v16 }
  0xd9   : > { %2205 = vrot.lane.b32.xlu1 %v2928_v3, %s2520_s22  ;;  %v2046_v39 = vpop.permute.xlu2 %2045 }
  0xda   : > { %v2048_v22 = vunpack.i.h.bf16 %v2046_v39  ;;  %v2047_v52 = vunpack.i.l.bf16 %v2046_v39  ;;  %2200 = vrot.lane.b32.xlu0 %v4116_v54, %s2520_s22 }
  0xdb   : > { %v1996_v43 = vpop.permute.xlu1 %1995 }
  0xdc   : > { %v3299_v44 = vsel %vm1296_vm4, %v1282_v28, %v2047_v52  ;;  %v3302_v58 = vsel %vm1296_vm4, %v1283_v34, %v2048_v22  ;;  %v1998_v42 = vunpack.i.h.bf16 %v1996_v43  ;;  %v1997_v41 = vunpack.i.l.bf16 %v1996_v43  ;;  %v1991_v40 = vpop.permute.xlu0 %1990  ;;  %v2481_v22 = vld [vmem:[%s2559_s17 + $0x38] sm:$0xff] }
  0xdd   : > { %v1993_v20 = vunpack.i.h.bf16 %v1991_v40  ;;  %v1992_v28 = vunpack.i.l.bf16 %v1991_v40  ;;  %v1260_v34 = vsel %vm1230_vm3, %v4117_v53, %v1913_v38  ;;  %v2480_v38 = vld [vmem:[%s2559_s17 + $0x30] sm:$0xff] }
  0xde   : > { %v1294_v33 = vsel %vm1263_vm2, %v1261_v8, %v1997_v41  ;;  %v1295_v12 = vsel %vm1263_vm2, %v1262_v0, %v1998_v42  ;;  %v2239_v52 = vpack.i.bf16 %v2481_v22, %v2480_v38  ;;  %v3335_v41 = vpack.i.bf16 %v832_v1, %v830_v37  ;;  %v2484_v22 = vld [vmem:[%s2559_s17 + $0x60] sm:$0xff] }
  0xdf   : > { %2225 = vrot.lane.b32.xlu2 %v4119_v46, %s2520_s22  ;;  %v3316_v57 = vsel %vm1263_vm2, %v1260_v34, %v1993_v20  ;;  %v3319_v13 = vsel %vm1263_vm2, %v1259_v17, %v1992_v28  ;;  %v4123_v20 = vld [vmem:[#allocation26_spill] sm:$0xff]  ;;  %v4124_v34 = vld [vmem:[#allocation23_spill] sm:$0xff]  ;;  %v2482_v17 = vld [vmem:[%s2559_s17 + $0x78] sm:$0xff] }
  0xe1   : > { %2220 = vrot.lane.b32.xlu1 %v4120_v11, %s2520_s22  ;;  %v2061_v56 = vpop.permute.xlu2 %2060 }
  0xe2   : > { %v2063_v30 = vunpack.i.h.bf16 %v2061_v56  ;;  %v2062_v35 = vunpack.i.l.bf16 %v2061_v56  ;;  %2215 = vrot.lane.b32.xlu0 %v4121_v26, %s2520_s22  ;;  %v2483_v56 = vld [vmem:[%s2559_s17 + $0x80] sm:$0xff] }
  0xe3   : > { %v2011_v39 = vpop.permute.xlu1 %2010 }
  0xe4   : > { %v3330_v16 = vsel %vm1296_vm4, %v1288_v6, %v2062_v35  ;;  %v3333_v0 = vsel %vm1296_vm4, %v1289_v32, %v2063_v30  ;;  %v2013_v8 = vunpack.i.h.bf16 %v2011_v39  ;;  %v2012_v43 = vunpack.i.l.bf16 %v2011_v39  ;;  %v2006_v42 = vpop.permute.xlu0 %2005  ;;  %v4122_v6 = vld [vmem:[#allocation7_spill] sm:$0xff] }
  0xe5   : > { %v2008_v19 = vunpack.i.h.bf16 %v2006_v42  ;;  %v2007_v23 = vunpack.i.l.bf16 %v2006_v42  ;;  %v2254_v30 = vpack.i.bf16 %v2483_v56, %v2482_v17  ;;  %v2488_v56 = vld [vmem:[%s2559_s17 + $0xc0] sm:$0xff] }
  0xe6   : > { %v1301_v40 = vsel %vm1296_vm4, %v3188_v50, %v2012_v43  ;;  %v1302_v5 = vsel %vm1296_vm4, %v3185_v24, %v2013_v8 }
  0xe7   : > { %2240 = vrot.lane.b32.xlu2 %v2239_v52, %s2521_s23  ;;  %v3344_v32 = vsel %vm1296_vm4, %v4122_v6, %v2007_v23  ;;  %v3348_v28 = vsel %vm1296_vm4, %v4123_v20, %v2008_v19  ;;  %v2485_v52 = vld [vmem:[%s2559_s17 + $0x68] sm:$0xff]  ;;  %v2487_v23 = vld [vmem:[%s2559_s17 + $0x50] sm:$0xff] }
  0xe8   : > { %v2249_v8 = vpack.i.bf16 %v2485_v52, %v2484_v22  ;;  %v4125_v20 = vld [vmem:[#allocation27_spill] sm:$0xff] }
  0xe9   : > { %2235 = vrot.lane.b32.xlu1 %v3335_v41, %s2520_s22  ;;  %v2076_v50 = vpop.permute.xlu2 %2075 }
  0xea   : > { %v2078_v24 = vunpack.i.h.bf16 %v2076_v50  ;;  %v2077_v53 = vunpack.i.l.bf16 %v2076_v50  ;;  %2230 = vrot.lane.b32.xlu0 %v4124_v34, %s2520_s22 }
  0xeb   : > { %v2026_v21 = vpop.permute.xlu1 %2025 }
  0xec   : > { %v3357_v35 = vsel %vm1296_vm4, %v1294_v33, %v2077_v53  ;;  %v3360_v37 = vsel %vm1296_vm4, %v1295_v12, %v2078_v24  ;;  %v2028_v1 = vunpack.i.h.bf16 %v2026_v21  ;;  %v2027_v39 = vunpack.i.l.bf16 %v2026_v21  ;;  %v2021_v38 = vpop.permute.xlu0 %2020  ;;  %v2486_v12 = vld [vmem:[%s2559_s17 + $0x48] sm:$0xff]  ;;  %v4126_v24 = vld [vmem:[#allocation28_spill] sm:$0xff] }
  0xed   : > { %v2023_v19 = vunpack.i.h.bf16 %v2021_v38  ;;  %v2022_v33 = vunpack.i.l.bf16 %v2021_v38  ;;  %v2244_v6 = vpack.i.bf16 %v2487_v23, %v2486_v12 }
  0xee   : > { %v1307_v43 = vsel %vm1296_vm4, %v3220_v62, %v2027_v39  ;;  %v1308_v42 = vsel %vm1296_vm4, %v3217_v63, %v2028_v1 }
  0xef   : > { %2255 = vrot.lane.b32.xlu2 %v2254_v30, %s2521_s23  ;;  %v3373_v50 = vsel %vm1296_vm4, %v4125_v20, %v2023_v19  ;;  %v3377_v53 = vsel %vm1296_vm4, %v4126_v24, %v2022_v33  ;;  %v2489_v30 = vld [vmem:[%s2559_s17 + $0xc8] sm:$0xff]  ;;  %v2491_v33 = vld [vmem:[%s2559_s17 + $0xb0] sm:$0xff]  ;;  %v2493_v24 = vld [vmem:[%s2559_s17 + $0x98] sm:$0xff] }
  0xf0   : > { %v2269_v1 = vpack.i.bf16 %v2489_v30, %v2488_v56  ;;  %v2490_v19 = vld [vmem:[%s2559_s17 + $0xa8] sm:$0xff] }
  0xf1   : > { %2250 = vrot.lane.b32.xlu1 %v2249_v8, %s2521_s23  ;;  %v2091_v63 = vpop.permute.xlu2 %2090  ;;  %v2264_v12 = vpack.i.bf16 %v2491_v33, %v2490_v19 }
  0xf2   : > { %v2093_v62 = vunpack.i.h.bf16 %v2091_v63  ;;  %v2092_v21 = vunpack.i.l.bf16 %v2091_v63  ;;  %2245 = vrot.lane.b32.xlu0 %v2244_v6, %s2521_s23 }
  0xf3   : > { %v2041_v17 = vpop.permute.xlu1 %2040 }
  0xf4   : > { %v3384_v39 = vsel %vm1329_vm5, %v1301_v40, %v2092_v21  ;;  %v3387_v38 = vsel %vm1329_vm5, %v1302_v5, %v2093_v62  ;;  %v2043_v22 = vunpack.i.h.bf16 %v2041_v17  ;;  %v2042_v52 = vunpack.i.l.bf16 %v2041_v17  ;;  %v2036_v8 = vpop.permute.xlu0 %2035  ;;  %v2492_v5 = vld [vmem:[%s2559_s17 + $0x90] sm:$0xff]  ;;  %v4127_v62 = vld [vmem:[#allocation29_spill] sm:$0xff]  ;;  %v4128_v17 = vld [vmem:[#allocation30_spill] sm:$0xff] }
  0xf5   : > { %v2038_v20 = vunpack.i.h.bf16 %v2036_v8  ;;  %v2037_v40 = vunpack.i.l.bf16 %v2036_v8  ;;  %v2259_v63 = vpack.i.bf16 %v2493_v24, %v2492_v5  ;;  %v2496_v5 = vld [vmem:[%s2559_s17 + $0xf0] sm:$0xff]  ;;  %v2497_v24 = vld [vmem:[%s2559_s17 + $0xf8] sm:$0xff] }
  0xf6   : > { %v1313_v23 = vsel %vm1296_vm4, %v3252_v48, %v2042_v52  ;;  %v1314_v6 = vsel %vm1296_vm4, %v3249_v49, %v2043_v22  ;;  %v2494_v22 = vld [vmem:[%s2559_s17 + $0x150] sm:$0xff]  ;;  %v2495_v52 = vld [vmem:[%s2559_s17 + $0x158] sm:$0xff] }
  0xf7   : > { %2270 = vrot.lane.b32.xlu2 %v2269_v1, %s2521_s23  ;;  %v3400_v21 = vsel %vm1296_vm4, %v4127_v62, %v2038_v20  ;;  %v3404_v48 = vsel %vm1296_vm4, %v4128_v17, %v2037_v40  ;;  %v2284_v8 = vpack.i.bf16 %v2495_v52, %v2494_v22  ;;  %v2279_v62 = vpack.i.bf16 %v2497_v24, %v2496_v5  ;;  %v4130_v52 = vld [vmem:[#allocation32_spill] sm:$0xff] }
  0xf9   : > { %2265 = vrot.lane.b32.xlu1 %v2264_v12, %s2521_s23  ;;  %v2106_v49 = vpop.permute.xlu2 %2105 }
  0xfa   : > { %v2108_v56 = vunpack.i.h.bf16 %v2106_v49  ;;  %v2107_v30 = vunpack.i.l.bf16 %v2106_v49  ;;  %2260 = vrot.lane.b32.xlu0 %v2259_v63, %s2521_s23 }
  0xfb   : > { %v2056_v1 = vpop.permute.xlu1 %2055 }
  0xfc   : > { %v3411_v19 = vsel %vm1329_vm5, %v1307_v43, %v2107_v30  ;;  %v3414_v33 = vsel %vm1329_vm5, %v1308_v42, %v2108_v56  ;;  %v2058_v20 = vunpack.i.h.bf16 %v2056_v1  ;;  %v2057_v40 = vunpack.i.l.bf16 %v2056_v1  ;;  %v2051_v12 = vpop.permute.xlu0 %2050  ;;  %v2498_v43 = vld [vmem:[%s2559_s17 + $0xd8] sm:$0xff]  ;;  %v2499_v30 = vld [vmem:[%s2559_s17 + $0xe0] sm:$0xff]  ;;  %v4129_v56 = vld [vmem:[#allocation31_spill] sm:$0xff] }
  0xfd   : > { %v2053_v49 = vunpack.i.h.bf16 %v2051_v12  ;;  %v2052_v22 = vunpack.i.l.bf16 %v2051_v12  ;;  %v2274_v42 = vpack.i.bf16 %v2499_v30, %v2498_v43 }
  0xfe   : > { %v1319_v63 = vsel %vm1296_vm4, %v3286_v59, %v2057_v40  ;;  %v1320_v17 = vsel %vm1296_vm4, %v3283_v61, %v2058_v20 }
  0xff   : > { %2285 = vrot.lane.b32.xlu2 %v2284_v8, %s2521_s23  ;;  %v3427_v1 = vsel %vm1296_vm4, %v4129_v56, %v2053_v49  ;;  %v3431_v5 = vsel %vm1296_vm4, %v4130_v52, %v2052_v22 }
 0x101   : > { %2280 = vrot.lane.b32.xlu1 %v2279_v62, %s2521_s23  ;;  %v2121_v59 = vpop.permute.xlu2 %2120 }
 0x102   : > { %v2123_v40 = vunpack.i.h.bf16 %v2121_v59  ;;  %v2122_v61 = vunpack.i.l.bf16 %v2121_v59  ;;  %2275 = vrot.lane.b32.xlu0 %v2274_v42, %s2521_s23  ;;  %v4132_v59 = vld [vmem:[#allocation14_spill] sm:$0xff] }
 0x103   : > { %v2071_v20 = vpop.permute.xlu1 %2070 }
 0x104   : > { %v3436_v8 = vsel %vm1329_vm5, %v1313_v23, %v2122_v61  ;;  %v3439_v12 = vsel %vm1329_vm5, %v1314_v6, %v2123_v40  ;;  %v2073_v24 = vunpack.i.h.bf16 %v2071_v20  ;;  %v2072_v49 = vunpack.i.l.bf16 %v2071_v20  ;;  %v2066_v43 = vpop.permute.xlu0 %2065 }
 0x105   : > { %v2068_v30 = vunpack.i.h.bf16 %v2066_v43  ;;  %v2067_v56 = vunpack.i.l.bf16 %v2066_v43 }
 0x106   : > { %v1325_v22 = vsel %vm1296_vm4, %v3319_v13, %v2072_v49  ;;  %v1326_v62 = vsel %vm1296_vm4, %v3316_v57, %v2073_v24  ;;  %v4131_v13 = vld [vmem:[#allocation16_spill] sm:$0xff] }
 0x107   : > { %2300 = vrot.lane.b32.xlu2 %v2928_v3, %s2522_s24  ;;  %v3449_v23 = vsel %vm1296_vm4, %v3165_v60, %v2068_v30  ;;  %v3453_v6 = vsel %vm1296_vm4, %v3168_v27, %v2067_v56  ;;  %v4133_v56 = vld [vmem:[#allocation10_spill] sm:$0xff] }
 0x109   : > { %2295 = vrot.lane.b32.xlu1 %v4131_v13, %s2523_s25  ;;  %v2136_v42 = vpop.permute.xlu2 %2135  ;;  %v4134_v13 = vld [vmem:[#allocation4_spill] sm:$0xff] }
 0x10a   : > { %v2138_v57 = vunpack.i.h.bf16 %v2136_v42  ;;  %v2137_v52 = vunpack.i.l.bf16 %v2136_v42  ;;  %2290 = vrot.lane.b32.xlu0 %v4132_v59, %s2523_s25  ;;  %v2501_v59 = vld [vmem:[%s2559_s17 + $0x110] sm:$0xff] }
 0x10b   : > { %v2086_v40 = vpop.permute.xlu1 %2085 }
 0x10c   : > { %v3460_v3 = vsel %vm1329_vm5, %v1319_v63, %v2137_v52  ;;  %v3463_v60 = vsel %vm1329_vm5, %v1320_v17, %v2138_v57  ;;  %v2088_v61 = vunpack.i.h.bf16 %v2086_v40  ;;  %v2087_v27 = vunpack.i.l.bf16 %v2086_v40  ;;  %v2081_v20 = vpop.permute.xlu0 %2080  ;;  %v2500_v52 = vld [vmem:[%s2559_s17 + $0x108] sm:$0xff] }
 0x10d   : > { %v2083_v43 = vunpack.i.h.bf16 %v2081_v20  ;;  %v2082_v30 = vunpack.i.l.bf16 %v2081_v20  ;;  %v2329_v40 = vpack.i.bf16 %v2501_v59, %v2500_v52 }
 0x10e   : > { %v1332_v24 = vsel %vm1329_vm5, %v3344_v32, %v2087_v27  ;;  %v1333_v49 = vsel %vm1329_vm5, %v3348_v28, %v2088_v61 }
 0x10f   : > { %2315 = vrot.lane.b32.xlu2 %v4133_v56, %s2523_s25  ;;  %v3473_v63 = vsel %vm1329_vm5, %v3199_v15, %v2082_v30  ;;  %v3477_v17 = vsel %vm1329_vm5, %v3202_v14, %v2083_v43 }
 0x111   : > { %2310 = vrot.lane.b32.xlu1 %v4134_v13, %s2523_s25  ;;  %v2151_v32 = vpop.permute.xlu2 %2150 }
 0x112   : > { %v2153_v42 = vunpack.i.h.bf16 %v2151_v32  ;;  %v2152_v57 = vunpack.i.l.bf16 %v2151_v32  ;;  %2305 = vrot.lane.b32.xlu0 %v4119_v46, %s2522_s24 }
 0x113   : > { %v2101_v28 = vpop.permute.xlu1 %2100 }
 0x114   : > { %v3486_v15 = vsel %vm1329_vm5, %v1325_v22, %v2152_v57  ;;  %v3489_v61 = vsel %vm1329_vm5, %v1326_v62, %v2153_v42  ;;  %v2103_v14 = vunpack.i.h.bf16 %v2101_v28  ;;  %v2102_v27 = vunpack.i.l.bf16 %v2101_v28  ;;  %v2096_v20 = vpop.permute.xlu0 %2095 }
 0x115   : > { %v2098_v46 = vunpack.i.h.bf16 %v2096_v20  ;;  %v2097_v56 = vunpack.i.l.bf16 %v2096_v20 }
 0x116   : > { %v1338_v43 = vsel %vm1329_vm5, %v3377_v53, %v2102_v27  ;;  %v1339_v30 = vsel %vm1329_vm5, %v3373_v50, %v2103_v14  ;;  %v2502_v14 = vld [vmem:[%s2559_s17 + $0x168] sm:$0xff] }
 0x117   : > { %2330 = vrot.lane.b32.xlu2 %v2329_v40, %s2521_s23  ;;  %v3498_v22 = vsel %vm1329_vm5, %v3234_v51, %v2098_v46  ;;  %v3502_v62 = vsel %vm1329_vm5, %v3231_v7, %v2097_v56 }
 0x119   : > { %2325 = vrot.lane.b32.xlu1 %v2908_v10, %s2522_s24  ;;  %v2166_v53 = vpop.permute.xlu2 %2165 }
 0x11a   : > { %v2168_v50 = vunpack.i.h.bf16 %v2166_v53  ;;  %v2167_v13 = vunpack.i.l.bf16 %v2166_v53  ;;  %2320 = vrot.lane.b32.xlu0 %v2888_v2, %s2522_s24  ;;  %v4135_v2 = vld [vmem:[#allocation19_spill] sm:$0xff] }
 0x11b   : > { %v2116_v32 = vpop.permute.xlu1 %2115 }
 0x11c   : > { %v3509_v51 = vsel %vm1362_vm6, %v1332_v24, %v2167_v13  ;;  %v3512_v42 = vsel %vm1362_vm6, %v1333_v49, %v2168_v50  ;;  %v2118_v7 = vunpack.i.h.bf16 %v2116_v32  ;;  %v2117_v57 = vunpack.i.l.bf16 %v2116_v32  ;;  %v2111_v28 = vpop.permute.xlu0 %2110  ;;  %v2503_v24 = vld [vmem:[%s2559_s17 + $0x170] sm:$0xff] }
 0x11d   : > { %v2113_v59 = vunpack.i.h.bf16 %v2111_v28  ;;  %v2112_v40 = vunpack.i.l.bf16 %v2111_v28  ;;  %v2334_v27 = vpack.i.bf16 %v2503_v24, %v2502_v14 }
 0x11e   : > { %v1344_v10 = vsel %vm1329_vm5, %v3404_v48, %v2117_v57  ;;  %v1345_v52 = vsel %vm1329_vm5, %v3400_v21, %v2118_v7  ;;  %v4136_v48 = vld [vmem:[#allocation13_spill] sm:$0xff] }
 0x11f   : > { %2345 = vrot.lane.b32.xlu2 %v4135_v2, %s2523_s25  ;;  %v3524_v49 = vsel %vm1329_vm5, %v3263_v36, %v2112_v40  ;;  %v3528_v20 = vsel %vm1329_vm5, %v3266_v18, %v2113_v59  ;;  %v4137_v40 = vld [vmem:[#allocation6_spill] sm:$0xff] }
 0x121   : > { %2340 = vrot.lane.b32.xlu1 %v4136_v48, %s2523_s25  ;;  %v2181_v21 = vpop.permute.xlu2 %2180 }
 0x122   : > { %v2183_v46 = vunpack.i.h.bf16 %v2181_v21  ;;  %v2182_v56 = vunpack.i.l.bf16 %v2181_v21  ;;  %2335 = vrot.lane.b32.xlu0 %v2334_v27, %s2521_s23 }
 0x123   : > { %v2131_v53 = vpop.permute.xlu1 %2130 }
 0x124   : > { %v3534_v50 = vsel %vm1362_vm6, %v1338_v43, %v2182_v56  ;;  %v3537_v13 = vsel %vm1362_vm6, %v1339_v30, %v2183_v46  ;;  %v2133_v36 = vunpack.i.h.bf16 %v2131_v53  ;;  %v2132_v32 = vunpack.i.l.bf16 %v2131_v53  ;;  %v2126_v7 = vpop.permute.xlu0 %2125  ;;  %v4138_v53 = vld [vmem:[#allocation9_spill] sm:$0xff] }
 0x125   : > { %v2128_v28 = vunpack.i.h.bf16 %v2126_v7  ;;  %v2127_v59 = vunpack.i.l.bf16 %v2126_v7 }
 0x126   : > { %v1350_v18 = vsel %vm1329_vm5, %v3431_v5, %v2132_v32  ;;  %v1351_v57 = vsel %vm1329_vm5, %v3427_v1, %v2133_v36 }
 0x127   : > { %2360 = vrot.lane.b32.xlu2 %v4137_v40, %s2523_s25  ;;  %v3547_v43 = vsel %vm1329_vm5, %v3299_v44, %v2127_v59  ;;  %v3551_v30 = vsel %vm1329_vm5, %v3302_v58, %v2128_v28 }
 0x129   : > { %2355 = vrot.lane.b32.xlu1 %v4124_v34, %s2522_s24  ;;  %v2196_v5 = vpop.permute.xlu2 %2195 }
 0x12a   : > { %v2198_v2 = vunpack.i.h.bf16 %v2196_v5  ;;  %v2197_v14 = vunpack.i.l.bf16 %v2196_v5  ;;  %2350 = vrot.lane.b32.xlu0 %v2966_v55, %s2522_s24  ;;  %v4139_v5 = vld [vmem:[#allocation18_spill] sm:$0xff] }
 0x12b   : > { %v2146_v1 = vpop.permute.xlu1 %2145 }
 0x12c   : > { %v3558_v24 = vsel %vm1362_vm6, %v1344_v10, %v2197_v14  ;;  %v3561_v44 = vsel %vm1362_vm6, %v1345_v52, %v2198_v2  ;;  %v2148_v27 = vunpack.i.h.bf16 %v2146_v1  ;;  %v2147_v48 = vunpack.i.l.bf16 %v2146_v1  ;;  %v2141_v58 = vpop.permute.xlu0 %2140  ;;  %v2505_v2 = vld [vmem:[%s2559_s17 + $0x128] sm:$0xff]  ;;  %v4140_v1 = vld [vmem:[#allocation25_spill] sm:$0xff] }
 0x12d   : > { %v2143_v46 = vunpack.i.h.bf16 %v2141_v58  ;;  %v2142_v56 = vunpack.i.l.bf16 %v2141_v58 }
 0x12e   : > { %v1356_v21 = vsel %vm1329_vm5, %v3453_v6, %v2147_v48  ;;  %v1357_v34 = vsel %vm1329_vm5, %v3449_v23, %v2148_v27 }
 0x12f   : > { %2375 = vrot.lane.b32.xlu2 %v2901_v29, %s2522_s24  ;;  %v3571_v55 = vsel %vm1329_vm5, %v3330_v16, %v2142_v56  ;;  %v3575_v10 = vsel %vm1329_vm5, %v3333_v0, %v2143_v46 }
 0x131   : > { %2370 = vrot.lane.b32.xlu1 %v2881_v31, %s2522_s24  ;;  %v2211_v6 = vpop.permute.xlu2 %2210 }
 0x132   : > { %v2213_v23 = vunpack.i.h.bf16 %v2211_v6  ;;  %v2212_v52 = vunpack.i.l.bf16 %v2211_v6  ;;  %2365 = vrot.lane.b32.xlu0 %v4138_v53, %s2523_s25 }
 0x133   : > { %v2161_v29 = vpop.permute.xlu1 %2160 }
 0x134   : > { %v3582_v36 = vsel %vm1362_vm6, %v1350_v18, %v2212_v52  ;;  %v3585_v16 = vsel %vm1362_vm6, %v1351_v57, %v2213_v23  ;;  %v2163_v0 = vunpack.i.h.bf16 %v2161_v29  ;;  %v2162_v32 = vunpack.i.l.bf16 %v2161_v29  ;;  %v2156_v7 = vpop.permute.xlu0 %2155  ;;  %v2504_v18 = vld [vmem:[%s2559_s17 + $0x120] sm:$0xff] }
 0x135   : > { %v2158_v59 = vunpack.i.h.bf16 %v2156_v7  ;;  %v2157_v40 = vunpack.i.l.bf16 %v2156_v7  ;;  %v2379_v57 = vpack.i.bf16 %v2505_v2, %v2504_v18 }
 0x136   : > { %v3589_v31 = vsel %vm1362_vm6, %v3473_v63, %v2162_v32  ;;  %v3593_v28 = vsel %vm1362_vm6, %v3477_v17, %v2163_v0 }
 0x137   : > { %2390 = vrot.lane.b32.xlu2 %v4139_v5, %s2523_s25  ;;  %v3601_v14 = vsel %vm1329_vm5, %v3357_v35, %v2157_v40  ;;  %v3605_v63 = vsel %vm1329_vm5, %v3360_v37, %v2158_v59  ;;  %v223_v40 = vld [vmem:[%s2559_s17 + $0x198] sm:$0xff]  ;;  %v224_v5 = vld [vmem:[%s2559_s17 + $0x1a0] sm:$0xff] }
 0x139   : > { %2385 = vrot.lane.b32.xlu1 %v4140_v1, %s2521_s23  ;;  %v2226_v17 = vpop.permute.xlu2 %2225  ;;  %v225_v1 = vld [vmem:[%s2559_s17 + $0x1a8] sm:$0x3] }
 0x13a   : > { %v2228_v27 = vunpack.i.h.bf16 %v2226_v17  ;;  %v2227_v48 = vunpack.i.l.bf16 %v2226_v17  ;;  %2380 = vrot.lane.b32.xlu0 %v2379_v57, %s2521_s23  ;;  %v2434_v57 = vpack.i.bf16 %v224_v5, %v223_v40 }
 0x13b   : > { %v2176_v58 = vpop.permute.xlu1 %2175 }
 0x13c   : > { %v3611_v46 = vsel %vm1362_vm6, %v1356_v21, %v2227_v48  ;;  %v3614_v56 = vsel %vm1362_vm6, %v1357_v34, %v2228_v27  ;;  %v2178_v35 = vunpack.i.h.bf16 %v2176_v58  ;;  %v2177_v6 = vunpack.i.l.bf16 %v2176_v58  ;;  %v2171_v23 = vpop.permute.xlu0 %2170 }
 0x13d   : > { %v2173_v53 = vunpack.i.h.bf16 %v2171_v23  ;;  %v2172_v29 = vunpack.i.l.bf16 %v2171_v23  ;;  %v2507_v23 = vld [vmem:[%s2559_s17 + $0x140] sm:$0xff] }
 0x13e   : > { %v1369_v37 = vsel %vm1362_vm6, %v3502_v62, %v2177_v6  ;;  %v1370_v52 = vsel %vm1362_vm6, %v3498_v22, %v2178_v35  ;;  %v1029_v35 = vrot.slane %v224_v5, 1  ;;  %v2506_v6 = vld [vmem:[%s2559_s17 + $0x138] sm:$0xff] }
 0x13f   : > { %2405 = vrot.lane.b32.xlu2 %v3335_v41, %s2522_s24  ;;  %v3624_v21 = vsel %vm1362_vm6, %v3384_v39, %v2172_v29  ;;  %v3628_v34 = vsel %vm1362_vm6, %v3387_v38, %v2173_v53  ;;  %v2429_v53 = vpack.i.bf16 %v2507_v23, %v2506_v6 }
 0x141   : > { %2400 = vrot.lane.b32.xlu1 %v4121_v26, %s2522_s24  ;;  %v3632_v62 = vpop.permute.xlu2 %2240 }
 0x142   : > { %2395 = vrot.lane.b32.xlu0 %v3182_v25, %s2523_s25 }
 0x143   : > { %v2191_v22 = vpop.permute.xlu1 %2190 }
 0x144   : > { %v2193_v41 = vunpack.i.h.bf16 %v2191_v22  ;;  %v2192_v0 = vunpack.i.l.bf16 %v2191_v22  ;;  %v2186_v32 = vpop.permute.xlu0 %2185 }
 0x145   : > { %v2188_v7 = vunpack.i.h.bf16 %v2186_v32  ;;  %v2187_v59 = vunpack.i.l.bf16 %v2186_v32 }
 0x146   : > { %v1375_v39 = vsel %vm1362_vm6, %v3524_v49, %v2192_v0  ;;  %v1376_v38 = vsel %vm1362_vm6, %v3528_v20, %v2193_v41  ;;  %v4141_v49 = vld [vmem:[#allocation8_spill] sm:$0xff]  ;;  %v1031_v41 = vrot.slane %v225_v1, 1 }
 0x147   : > { %2420 = vrot.lane.b32.xlu2 %v2874_v45, %s2522_s24  ;;  %v3644_v26 = vsel %vm1362_vm6, %v3411_v19, %v2187_v59  ;;  %v3648_v25 = vsel %vm1362_vm6, %v3414_v33, %v2188_v7  ;;  %v4142_v45 = vld [vmem:[#allocation3_spill] sm:$0xff] }
 0x148   : > { %v1032_v59 = vsel %vm274_vm0, %v1029_v35, %v1031_v41  ;;  %v4143_v41 = vld [vmem:[#allocation15_spill] sm:$0xff] }
 0x149   : > { %2415 = vrot.lane.b32.xlu1 %v4141_v49, %s2523_s25  ;;  %v2256_v20 = vpop.permute.xlu2 %2255 }
 0x14a   : > { %v2258_v18 = vunpack.i.h.bf16 %v2256_v20  ;;  %v2257_v2 = vunpack.i.l.bf16 %v2256_v20  ;;  %2410 = vrot.lane.b32.xlu0 %v4142_v45, %s2523_s25 }
 0x14b   : > { %v2206_v19 = vpop.permute.xlu1 %2205 }
 0x14c   : > { %v3658_v33 = vsel %vm1395_vm7, %v1369_v37, %v2257_v2  ;;  %v3661_v17 = vsel %vm1395_vm7, %v1370_v52, %v2258_v18  ;;  %v2208_v27 = vunpack.i.h.bf16 %v2206_v19  ;;  %v2207_v48 = vunpack.i.l.bf16 %v2206_v19  ;;  %v3663_v58 = vpop.permute.xlu0 %2200 }
 0x14d   : > { %v1028_v37 = vrot.slane %v223_v40, 1  ;;  %v1130_v19 = vrot.slane %v224_v5, 2 }
 0x14e   : > { %v3669_v29 = vsel %vm1362_vm6, %v3547_v43, %v2207_v48  ;;  %v3673_v22 = vsel %vm1362_vm6, %v3551_v30, %v2208_v27  ;;  %v1132_v27 = vrot.slane %v225_v1, 2 }
 0x14f   : > { %2435 = vrot.lane.b32.xlu2 %v2434_v57, %s2521_s23  ;;  %v1030_v7 = vsel %vm274_vm0, %v1028_v37, %v1029_v35  ;;  %v1129_v57 = vrot.slane %v223_v40, 2 }
 0x150   : > { %v2444_v18 = vpack.i.bf16 %v1032_v59, %v1030_v7  ;;  %v1133_v40 = vsel %vm451_vm1, %v1130_v19, %v1132_v27 }
 0x151   : > { %2430 = vrot.lane.b32.xlu1 %v2429_v53, %s2521_s23  ;;  %v2271_v52 = vpop.permute.xlu2 %2270 }
 0x152   : > { %v2273_v0 = vunpack.i.h.bf16 %v2271_v52  ;;  %v2272_v32 = vunpack.i.l.bf16 %v2271_v52  ;;  %2425 = vrot.lane.b32.xlu0 %v2942_v9, %s2522_s24 }
 0x153   : > { %v3681_v43 = vpop.permute.xlu1 %2220 }
 0x154   : > { %v3684_v30 = vsel %vm1395_vm7, %v1375_v39, %v2272_v32  ;;  %v3687_v49 = vsel %vm1395_vm7, %v1376_v38, %v2273_v0  ;;  %v2216_v20 = vpop.permute.xlu0 %2215  ;;  %v2524_v0 = vmov 65535  }
 0x155   : > { %v2218_v2 = vunpack.i.h.bf16 %v2216_v20  ;;  %v2217_v45 = vunpack.i.l.bf16 %v2216_v20  ;;  %v1572_v32 = vsel %vm1570_vm8, 4294967295, %v2524_v0 }
 0x156   : > { %v1573_v59 = vsel %vm1571_vm9, %v1572_v32, 0 }
 0x157   : > { %2450 = vrot.lane.b32.xlu2 %v4120_v11, %s2522_s24  ;;  %v3693_v9 = vsel %vm1362_vm6, %v3460_v3, %v2217_v45  ;;  %v3697_v39 = vsel %vm1362_vm6, %v3463_v60, %v2218_v2  ;;  %v1131_v11 = vsel %vm451_vm1, %v1129_v57, %v1130_v19  ;;  %v1796_v3 = vld [vmem:[%s4028_s1] sm:$0xf]  ;;  %v1817_v60 = vld [vmem:[%s4028_s1] sm:$0x10] }
 0x158   : > { %v1797_v35 = vor.u32 %v1817_v60, %v1796_v3  ;;  %v2454_v52 = vpack.i.bf16 %v1133_v40, %v1131_v11 }
 0x159   : > { %2445 = vrot.lane.b32.xlu1 %v2444_v18, %s2523_s25 }
 0x15a   : > { %2440 = vrot.lane.b32.xlu0 %v4115_v47, %s2523_s25  ;;  %v3710_v47 = vpop.permute.xlu2 %2285  ;;  %v1575_v20 = vand.u32 %v1797_v35, %v1573_v59  ;;  %v2223_v59 = vunpack.i.h.bf16 %v3681_v43 }
 0x15b   : > { %v2236_v38 = vpop.permute.xlu1 %2235 }
 0x15c   : > { %v2238_v5 = vunpack.i.h.bf16 %v2236_v38  ;;  %v2237_v48 = vunpack.i.l.bf16 %v2236_v38  ;;  %v2231_v1 = vpop.permute.xlu0 %2230  ;;  %1819 = vmatpush.bf16.msra.mxu2 %v1575_v20  ;;  %1820 = vmatpush.bf16.msra.mxu3 %v1575_v20 }
 0x15d   : > { %v2233_v53 = vunpack.i.h.bf16 %v2231_v1  ;;  %v2232_v37 = vunpack.i.l.bf16 %v2231_v1  ;;  %1584 = vmatpush.bf16.msra.mxu0 %v1575_v20  ;;  %1818 = vmatpush.bf16.msra.mxu1 %v1575_v20  ;;  %v2222_v20 = vunpack.i.l.bf16 %v3681_v43 }
 0x15e   : > { %v3714_v6 = vsel %vm1362_vm6, %v3601_v14, %v2237_v48  ;;  %v3718_v23 = vsel %vm1362_vm6, %v3605_v63, %v2238_v5  ;;  %v4144_v63 = vld [vmem:[#allocation5_spill] sm:$0xff] }
 0x15f   : > { %2465 = vrot.lane.b32.xlu2 %v4143_v41, %s2523_s25  ;;  %v3724_v7 = vsel %vm1362_vm6, %v3486_v15, %v2232_v37  ;;  %v3728_v14 = vsel %vm1362_vm6, %v3489_v61, %v2233_v53  ;;  %v1387_v43 = vsel %vm1362_vm6, %v3571_v55, %v2222_v20  ;;  %v2243_v55 = vunpack.i.h.bf16 %v3632_v62 }
 0x161   : > { %2460 = vrot.lane.b32.xlu1 %v4144_v63, %s2523_s25 }
 0x162   : > { %2455 = vrot.lane.b32.xlu0 %v2454_v52, %s2522_s24  ;;  %v2301_v57 = vpop.permute.xlu2 %2300 }
 0x163   : > { %v2251_v18 = vpop.permute.xlu1 %2250  ;;  %v2303_v41 = vunpack.i.h.bf16 %v2301_v57  ;;  %v2302_v52 = vunpack.i.l.bf16 %v2301_v57 }
 0x164   : > { %v2253_v2 = vunpack.i.h.bf16 %v2251_v18  ;;  %v2252_v45 = vunpack.i.l.bf16 %v2251_v18  ;;  %v3733_v19 = vpop.permute.xlu0 %2245 }
 0x166   : > { %v3737_v15 = vsel %vm1395_vm7, %v3624_v21, %v2252_v45  ;;  %v3741_v61 = vsel %vm1395_vm7, %v3628_v34, %v2253_v2 }
 0x169   : > { %2475 = vrot.lane.b32.xlu1 %v4116_v54, %s2522_s24  ;;  %v2202_v54 = vunpack.i.l.bf16 %v3663_v58 }
 0x16a   : > { %2470 = vrot.lane.b32.xlu0 %v2915_v4, %s2522_s24  ;;  %v3749_v5 = vpop.permute.xlu2 %2315  ;;  %v2203_v4 = vunpack.i.h.bf16 %v3663_v58 }
 0x16b   : > { %v3747_v27 = vpop.permute.xlu1 %2265  ;;  %v1379_v37 = vsel %vm1362_vm6, %v3436_v8, %v2202_v54  ;;  %v2288_v8 = vunpack.i.h.bf16 %v3710_v47  ;;  %v1388_v54 = vsel %vm1362_vm6, %v3575_v10, %v2223_v59  ;;  %v2318_v59 = vunpack.i.h.bf16 %v3749_v5 }
 0x16c   : > { %v2261_v38 = vpop.permute.xlu0 %2260  ;;  %v1380_v0 = vsel %vm1362_vm6, %v3439_v12, %v2203_v4  ;;  %v2287_v12 = vunpack.i.l.bf16 %v3710_v47 }
 0x16d   : > { %v1421_v47 = vsel %vm1395_vm7, %v1388_v54, %v2288_v8 }
 0x16e   : > { %v1420_v4 = vsel %vm1395_vm7, %v1387_v43, %v2287_v12 }
 0x172   : > { %v3761_v53 = vpop.permute.xlu2 %2330 }
 0x173   : > { %v2281_v48 = vpop.permute.xlu1 %2280 }
 0x174   : > { %v2276_v11 = vpop.permute.xlu0 %2275  ;;  %v2283_v60 = vunpack.i.h.bf16 %v2281_v48  ;;  %v2282_v1 = vunpack.i.l.bf16 %v2281_v48 }
 0x175   : > { %v2278_v21 = vunpack.i.h.bf16 %v2276_v11  ;;  %v2277_v40 = vunpack.i.l.bf16 %v2276_v11 }
 0x176   : > { %v1412_v58 = vsel %vm1395_vm7, %v1379_v37, %v2282_v1  ;;  %v1413_v63 = vsel %vm1395_vm7, %v1380_v0, %v2283_v60  ;;  %v2263_v1 = vunpack.i.h.bf16 %v2261_v38  ;;  %v2262_v37 = vunpack.i.l.bf16 %v2261_v38 }
 0x177   : > { %v3753_v34 = vsel %vm1395_vm7, %v3558_v24, %v2277_v40  ;;  %v3757_v3 = vsel %vm1395_vm7, %v3561_v44, %v2278_v21 }
 0x178   : > { %v1405_v20 = vsel %vm1395_vm7, %v3537_v13, %v2263_v1 }
 0x17b   : > { %v2296_v35 = vpop.permute.xlu1 %2295 }
 0x17c   : > { %v2291_v24 = vpop.permute.xlu0 %2290  ;;  %v2298_v11 = vunpack.i.h.bf16 %v2296_v35  ;;  %v2297_v21 = vunpack.i.l.bf16 %v2296_v35 }
 0x17d   : > { %v2293_v44 = vunpack.i.h.bf16 %v2291_v24  ;;  %v2292_v32 = vunpack.i.l.bf16 %v2291_v24 }
 0x17e   : > { %v1453_v35 = vsel %vm1428_vm11, %v1420_v4, %v2297_v21  ;;  %v1454_v0 = vsel %vm1428_vm11, %v1421_v47, %v2298_v11 }
 0x17f   : > { %v1445_v18 = vsel %vm1428_vm11, %v1412_v58, %v2292_v32  ;;  %v1446_v2 = vsel %vm1428_vm11, %v1413_v63, %v2293_v44  ;;  %v2242_v32 = vunpack.i.l.bf16 %v3632_v62  ;;  %v2317_v58 = vunpack.i.l.bf16 %v3749_v5 }
 0x180   : > { %v1478_v45 = vsel %vm1461_vm10, %v1445_v18, %v2302_v52  ;;  %v1479_v57 = vsel %vm1461_vm10, %v1446_v2, %v2303_v41  ;;  %v2346_v41 = vpop.permute.xlu2 %2345  ;;  %v1404_v63 = vsel %vm1395_vm7, %v3534_v50, %v2262_v37  ;;  %v1397_v5 = vsel %vm1395_vm7, %v3593_v28, %v2243_v55 }
 0x181   : > { %v1502_v48 = vpack.c.bf16 %v1479_v57, %v1478_v45  ;;  %v1396_v62 = vsel %vm1395_vm7, %v3589_v31, %v2242_v32  ;;  %v1438_v50 = vsel %vm1428_vm11, %v1405_v20, %v2318_v59  ;;  %v2348_v55 = vunpack.i.h.bf16 %v2346_v41 }
 0x183   : > { %v2311_v40 = vpop.permute.xlu1 %2310  ;;  %1806 = vmatmul.msk.bf16.vlgmr.msra.gmra.mxu2 %vm1521_vm12, %v1502_v48  ;;  %v1437_v48 = vsel %vm1428_vm11, %v1404_v63, %v2317_v58 }
 0x184   : > { %v2306_v60 = vpop.permute.xlu0 %2305  ;;  %v2313_v8 = vunpack.i.h.bf16 %v2311_v40  ;;  %v2312_v18 = vunpack.i.l.bf16 %v2311_v40 }
 0x185   : > { %v2308_v52 = vunpack.i.h.bf16 %v2306_v60  ;;  %v2307_v24 = vunpack.i.l.bf16 %v2306_v60 }
 0x186   : > { %v1429_v43 = vsel %vm1428_vm11, %v1396_v62, %v2312_v18  ;;  %v1430_v54 = vsel %vm1428_vm11, %v1397_v5, %v2313_v8 }
 0x187   : > { %v1486_v10 = vsel %vm1461_vm10, %v1453_v35, %v2307_v24  ;;  %v1487_v44 = vsel %vm1461_vm10, %v1454_v0, %v2308_v52  ;;  %v2333_v35 = vunpack.i.h.bf16 %v3761_v53  ;;  %v2332_v0 = vunpack.i.l.bf16 %v3761_v53 }
 0x188   : > { %v1506_v38 = vpack.c.bf16 %v1487_v44, %v1486_v10  ;;  %v2361_v31 = vpop.permute.xlu2 %2360  ;;  %v2347_v10 = vunpack.i.l.bf16 %v2346_v41 }
 0x189   : > { %v1414_v18 = vsel %vm1395_vm7, %v3669_v29, %v2332_v0  ;;  %v1415_v53 = vsel %vm1395_vm7, %v3673_v22, %v2333_v35  ;;  %v2248_v29 = vunpack.i.h.bf16 %v3733_v19  ;;  %v2247_v22 = vunpack.i.l.bf16 %v3733_v19 }
 0x18a   : > { %1810 = vmatmul.msk.bf16.vlgmr.msra.gmra.mxu3 %vm1521_vm12, %v1506_v38 }
 0x18b   : > { %v2326_v2 = vpop.permute.xlu1 %2325  ;;  %v1399_v19 = vsel %vm1395_vm7, %v3512_v42, %v2248_v29 }
 0x18c   : > { %v2328_v12 = vunpack.i.h.bf16 %v2326_v2  ;;  %v2327_v45 = vunpack.i.l.bf16 %v2326_v2  ;;  %v2321_v57 = vpop.permute.xlu0 %2320 }
 0x18d   : > { %v2323_v11 = vunpack.i.h.bf16 %v2321_v57  ;;  %v2322_v13 = vunpack.i.l.bf16 %v2321_v57 }
 0x18e   : > { %v1470_v21 = vsel %vm1461_vm10, %v1437_v48, %v2327_v45  ;;  %v1471_v40 = vsel %vm1461_vm10, %v1438_v50, %v2328_v12 }
 0x18f   : > { %v1498_v4 = vpack.c.bf16 %v1471_v40, %v1470_v21  ;;  %v1462_v47 = vsel %vm1461_vm10, %v1429_v43, %v2322_v13  ;;  %v1463_v28 = vsel %vm1461_vm10, %v1430_v54, %v2323_v11  ;;  %v2363_v13 = vunpack.i.h.bf16 %v2361_v31 }
 0x190   : > { %v1494_v60 = vpack.c.bf16 %v1463_v28, %v1462_v47  ;;  %v2376_v44 = vpop.permute.xlu2 %2375  ;;  %v2362_v21 = vunpack.i.l.bf16 %v2361_v31  ;;  %v2268_v43 = vunpack.i.h.bf16 %v3747_v27  ;;  %v2267_v54 = vunpack.i.l.bf16 %v3747_v27 }
 0x191   : > { %1802 = vmatmul.msk.bf16.vlgmr.msra.gmra.mxu1 %vm1521_vm12, %v1498_v4  ;;  %v1398_v47 = vsel %vm1395_vm7, %v3509_v51, %v2247_v22 }
 0x192   : > { %1798 = vmatmul.msk.bf16.vlgmr.msra.gmra.mxu0 %vm1521_vm12, %v1494_v60  ;;  %v1431_v31 = vsel %vm1428_vm11, %v1398_v47, %v2362_v21  ;;  %v1406_v51 = vsel %vm1395_vm7, %v3644_v26, %v2267_v54  ;;  %v1407_v42 = vsel %vm1395_vm7, %v3648_v25, %v2268_v43 }
 0x193   : > { %v2341_v1 = vpop.permute.xlu1 %2340 }
 0x194   : > { %v2336_v37 = vpop.permute.xlu0 %2335  ;;  %v2343_v58 = vunpack.i.h.bf16 %v2341_v1  ;;  %v2342_v38 = vunpack.i.l.bf16 %v2341_v1 }
 0x195   : > { %v2338_v52 = vunpack.i.h.bf16 %v2336_v37  ;;  %v2337_v24 = vunpack.i.l.bf16 %v2336_v37  ;;  %v1432_v37 = vsel %vm1428_vm11, %v1399_v19, %v2363_v13 }
 0x196   : > { %v1447_v5 = vsel %vm1428_vm11, %v1414_v18, %v2342_v38  ;;  %v1448_v57 = vsel %vm1428_vm11, %v1415_v53, %v2343_v58 }
 0x197   : > { %v1422_v32 = vsel %vm1395_vm7, %v3611_v46, %v2337_v24  ;;  %v1423_v59 = vsel %vm1395_vm7, %v3614_v56, %v2338_v52  ;;  %v2378_v52 = vunpack.i.h.bf16 %v2376_v44  ;;  %v2377_v24 = vunpack.i.l.bf16 %v2376_v44 }
 0x198   : > { %v1455_v41 = vsel %vm1428_vm11, %v1422_v32, %v2347_v10  ;;  %v1456_v12 = vsel %vm1428_vm11, %v1423_v59, %v2348_v55  ;;  %v2391_v28 = vpop.permute.xlu2 %2390 }
 0x199   : > { %v2393_v25 = vunpack.i.h.bf16 %v2391_v28 }
 0x19b   : > { %v2356_v63 = vpop.permute.xlu1 %2355 }
 0x19c   : > { %v2358_v20 = vunpack.i.h.bf16 %v2356_v63  ;;  %v2357_v8 = vunpack.i.l.bf16 %v2356_v63  ;;  %v2351_v2 = vpop.permute.xlu0 %2350 }
 0x19d   : > { %v2353_v46 = vunpack.i.h.bf16 %v2351_v2  ;;  %v2352_v45 = vunpack.i.l.bf16 %v2351_v2  ;;  %v2392_v2 = vunpack.i.l.bf16 %v2391_v28 }
 0x19e   : > { %v1488_v56 = vsel %vm1461_vm10, %v1455_v41, %v2357_v8  ;;  %v1489_v62 = vsel %vm1461_vm10, %v1456_v12, %v2358_v20 }
 0x19f   : > { %v1507_v48 = vpack.c.bf16 %v1489_v62, %v1488_v56  ;;  %v1480_v50 = vsel %vm1461_vm10, %v1447_v5, %v2352_v45  ;;  %v1481_v11 = vsel %vm1461_vm10, %v1448_v57, %v2353_v46 }
 0x1a0   : > { %v1503_v40 = vpack.c.bf16 %v1481_v11, %v1480_v50  ;;  %v2406_v26 = vpop.permute.xlu2 %2405 }
 0x1a1   : > { %1811 = vmatmul.msk.bf16.gmra.mxu3 %vm1521_vm12, %v1507_v48  ;;  %v2408_v57 = vunpack.i.h.bf16 %v2406_v26  ;;  %v2407_v48 = vunpack.i.l.bf16 %v2406_v26 }
 0x1a2   : > { %1807 = vmatmul.msk.bf16.gmra.mxu2 %vm1521_vm12, %v1503_v40 }
 0x1a3   : > { %v2371_v4 = vpop.permute.xlu1 %2370 }
 0x1a4   : > { %v2373_v60 = vunpack.i.h.bf16 %v2371_v4  ;;  %v2372_v1 = vunpack.i.l.bf16 %v2371_v4  ;;  %v2366_v35 = vpop.permute.xlu0 %2365 }
 0x1a5   : > { %v2368_v27 = vunpack.i.h.bf16 %v2366_v35  ;;  %v2367_v0 = vunpack.i.l.bf16 %v2366_v35 }
 0x1a6   : > { %v1464_v55 = vsel %vm1461_vm10, %v1431_v31, %v2372_v1  ;;  %v1465_v10 = vsel %vm1461_vm10, %v1432_v37, %v2373_v60 }
 0x1a7   : > { %v1495_v32 = vpack.c.bf16 %v1465_v10, %v1464_v55  ;;  %v1439_v59 = vsel %vm1428_vm11, %v1406_v51, %v2367_v0  ;;  %v1440_v58 = vsel %vm1428_vm11, %v1407_v42, %v2368_v27 }
 0x1a8   : > { %v1472_v44 = vsel %vm1461_vm10, %v1439_v59, %v2377_v24  ;;  %v1473_v38 = vsel %vm1461_vm10, %v1440_v58, %v2378_v52  ;;  %v2421_v54 = vpop.permute.xlu2 %2420 }
 0x1a9   : > { %1799 = vmatmul.msk.bf16.gmra.mxu0 %vm1521_vm12, %v1495_v32  ;;  %v1499_v63 = vpack.c.bf16 %v1473_v38, %v1472_v44  ;;  %v2422_v31 = vunpack.i.l.bf16 %v2421_v54 }
 0x1ab   : > { %v2386_v20 = vpop.permute.xlu1 %2385  ;;  %1803 = vmatmul.msk.bf16.gmra.mxu1 %vm1521_vm12, %v1499_v63 }
 0x1ac   : > { %v2381_v8 = vpop.permute.xlu0 %2380  ;;  %v2388_v46 = vunpack.i.h.bf16 %v2386_v20  ;;  %v2387_v45 = vunpack.i.l.bf16 %v2386_v20 }
 0x1ad   : > { %v2383_v18 = vunpack.i.h.bf16 %v2381_v8  ;;  %v2382_v53 = vunpack.i.l.bf16 %v2381_v8 }
 0x1ae   : > { %v1425_v40 = vsel %vm1395_vm7, %v3728_v14, %v2388_v46 }
 0x1af   : > { %v1416_v41 = vsel %vm1395_vm7, %v3582_v36, %v2382_v53  ;;  %v1417_v12 = vsel %vm1395_vm7, %v3585_v16, %v2383_v18  ;;  %v1424_v16 = vsel %vm1395_vm7, %v3724_v7, %v2387_v45  ;;  %v2423_v7 = vunpack.i.h.bf16 %v2421_v54 }
 0x1b0   : > { %v1449_v22 = vsel %vm1428_vm11, %v1416_v41, %v2392_v2  ;;  %v1450_v50 = vsel %vm1428_vm11, %v1417_v12, %v2393_v25  ;;  %v2436_v55 = vpop.permute.xlu2 %2435 }
 0x1b3   : > { %v2401_v56 = vpop.permute.xlu1 %2400 }
 0x1b4   : > { %v2403_v62 = vunpack.i.h.bf16 %v2401_v56  ;;  %v2402_v5 = vunpack.i.l.bf16 %v2401_v56  ;;  %v2396_v29 = vpop.permute.xlu0 %2395 }
 0x1b5   : > { %v2398_v11 = vunpack.i.h.bf16 %v2396_v29  ;;  %v2397_v13 = vunpack.i.l.bf16 %v2396_v29 }
 0x1b6   : > { %v1482_v21 = vsel %vm1461_vm10, %v1449_v22, %v2402_v5  ;;  %v1483_v36 = vsel %vm1461_vm10, %v1450_v50, %v2403_v62 }
 0x1b7   : > { %v1504_v43 = vpack.c.bf16 %v1483_v36, %v1482_v21  ;;  %v1457_v4 = vsel %vm1428_vm11, %v1424_v16, %v2397_v13  ;;  %v1458_v47 = vsel %vm1428_vm11, %v1425_v40, %v2398_v11 }
 0x1b8   : > { %v1490_v19 = vsel %vm1461_vm10, %v1457_v4, %v2407_v48  ;;  %v1491_v28 = vsel %vm1461_vm10, %v1458_v47, %v2408_v57  ;;  %v2451_v53 = vpop.permute.xlu2 %2450  ;;  %v2438_v57 = vunpack.i.h.bf16 %v2436_v55  ;;  %v2437_v48 = vunpack.i.l.bf16 %v2436_v55 }
 0x1b9   : > { %1808 = vmatmul.msk.bf16.gmra.mxu2 %vm1521_vm12, %v1504_v43  ;;  %v1508_v60 = vpack.c.bf16 %v1491_v28, %v1490_v19  ;;  %v2453_v25 = vunpack.i.h.bf16 %v2451_v53  ;;  %v2452_v2 = vunpack.i.l.bf16 %v2451_v53 }
 0x1ba   : > { %v1427_v13 = vsel %vm1395_vm7, %v3718_v23, %v2438_v57 }
 0x1bb   : > { %v2416_v1 = vpop.permute.xlu1 %2415  ;;  %1812 = vmatmul.msk.bf16.gmra.mxu3 %vm1521_vm12, %v1508_v60 }
 0x1bc   : > { %v2411_v37 = vpop.permute.xlu0 %2410  ;;  %v2418_v51 = vunpack.i.h.bf16 %v2416_v1  ;;  %v2417_v42 = vunpack.i.l.bf16 %v2416_v1 }
 0x1bd   : > { %v2413_v14 = vunpack.i.h.bf16 %v2411_v37  ;;  %v2412_v52 = vunpack.i.l.bf16 %v2411_v37 }
 0x1bf   : > { %v1433_v24 = vsel %vm1428_vm11, %v3737_v15, %v2412_v52  ;;  %v1434_v35 = vsel %vm1428_vm11, %v3741_v61, %v2413_v14  ;;  %v1441_v15 = vsel %vm1428_vm11, %v3684_v30, %v2417_v42  ;;  %v1442_v61 = vsel %vm1428_vm11, %v3687_v49, %v2418_v51 }
 0x1c0   : > { %v1466_v27 = vsel %vm1461_vm10, %v1433_v24, %v2422_v31  ;;  %v1467_v0 = vsel %vm1461_vm10, %v1434_v35, %v2423_v7  ;;  %v2466_v21 = vpop.permute.xlu2 %2465 }
 0x1c1   : > { %v1496_v10 = vpack.c.bf16 %v1467_v0, %v1466_v27  ;;  %v2468_v47 = vunpack.i.h.bf16 %v2466_v21  ;;  %v2467_v19 = vunpack.i.l.bf16 %v2466_v21 }
 0x1c3   : > { %v2431_v32 = vpop.permute.xlu1 %2430  ;;  %1800 = vmatmul.msk.bf16.gmra.mxu0 %vm1521_vm12, %v1496_v10  ;;  %v1443_v31 = vsel %vm1428_vm11, %v3753_v34, %v2467_v19  ;;  %v1444_v37 = vsel %vm1428_vm11, %v3757_v3, %v2468_v47  ;;  %v3920_v3 = vld [vmem:[%s4029_s2] ss:$0 sm:$0xff] }
 0x1c4   : > { %v2426_v59 = vpop.permute.xlu0 %2425  ;;  %v2433_v8 = vunpack.i.h.bf16 %v2431_v32  ;;  %v2432_v26 = vunpack.i.l.bf16 %v2431_v32 }
 0x1c5   : > { %v2428_v58 = vunpack.i.h.bf16 %v2426_v59  ;;  %v2427_v44 = vunpack.i.l.bf16 %v2426_v59 }
 0x1c6   : > { %v1418_v30 = vsel %vm1395_vm7, %v3693_v9, %v2432_v26  ;;  %v1419_v49 = vsel %vm1395_vm7, %v3697_v39, %v2433_v8  ;;  %v1426_v39 = vsel %vm1395_vm7, %v3714_v6, %v2437_v48 }
 0x1c7   : > { %v1474_v38 = vsel %vm1461_vm10, %v1441_v15, %v2427_v44  ;;  %v1475_v63 = vsel %vm1461_vm10, %v1442_v61, %v2428_v58 }
 0x1c8   : > { %v1500_v20 = vpack.c.bf16 %v1475_v63, %v1474_v38 }
 0x1ca   : > { %1804 = vmatmul.msk.bf16.gmra.mxu1 %vm1521_vm12, %v1500_v20 }
 0x1cb   : > { %v2446_v18 = vpop.permute.xlu1 %2445 }
 0x1cc   : > { %v2441_v41 = vpop.permute.xlu0 %2440  ;;  %v2448_v22 = vunpack.i.h.bf16 %v2446_v18  ;;  %v2447_v50 = vunpack.i.l.bf16 %v2446_v18 }
 0x1cd   : > { %v2443_v12 = vunpack.i.h.bf16 %v2441_v41  ;;  %v2442_v46 = vunpack.i.l.bf16 %v2441_v41 }
 0x1ce   : > { %v1459_v40 = vsel %vm1428_vm11, %v1426_v39, %v2447_v50  ;;  %v1460_v43 = vsel %vm1428_vm11, %v1427_v13, %v2448_v22 }
 0x1cf   : > { %v1451_v45 = vsel %vm1428_vm11, %v1418_v30, %v2442_v46  ;;  %v1452_v56 = vsel %vm1428_vm11, %v1419_v49, %v2443_v12 }
 0x1d0   : > { %v1484_v62 = vsel %vm1461_vm10, %v1451_v45, %v2452_v2  ;;  %v1485_v5 = vsel %vm1461_vm10, %v1452_v56, %v2453_v25 }
 0x1d1   : > { %v1505_v29 = vpack.c.bf16 %v1485_v5, %v1484_v62 }
 0x1d3   : > { %v2461_v11 = vpop.permute.xlu1 %2460  ;;  %1809 = vmatmul.msk.bf16.gmra.mxu2 %vm1521_vm12, %v1505_v29 }
 0x1d4   : > { %v2456_v9 = vpop.permute.xlu0 %2455  ;;  %v2463_v60 = vunpack.i.h.bf16 %v2461_v11  ;;  %v2462_v1 = vunpack.i.l.bf16 %v2461_v11 }
 0x1d5   : > { %v2458_v36 = vunpack.i.h.bf16 %v2456_v9  ;;  %v2457_v16 = vunpack.i.l.bf16 %v2456_v9 }
 0x1d6   : > { %v1435_v0 = vsel %vm1428_vm11, %v3658_v33, %v2462_v1  ;;  %v1436_v55 = vsel %vm1428_vm11, %v3661_v17, %v2463_v60 }
 0x1d7   : > { %v1492_v54 = vsel %vm1461_vm10, %v1459_v40, %v2457_v16  ;;  %v1493_v4 = vsel %vm1461_vm10, %v1460_v43, %v2458_v36 }
 0x1d8   : > { %v1509_v28 = vpack.c.bf16 %v1493_v4, %v1492_v54 }
 0x1da   : > { %1813 = vmatmul.msk.bf16.gmra.mxu3 %vm1521_vm12, %v1509_v28 }
 0x1db   : > { %v2476_v6 = vpop.permute.xlu1 %2475 }
 0x1dc   : > { %v2478_v23 = vunpack.i.h.bf16 %v2476_v6  ;;  %v2477_v7 = vunpack.i.l.bf16 %v2476_v6  ;;  %v2471_v14 = vpop.permute.xlu0 %2470 }
 0x1dd   : > { %v2473_v52 = vunpack.i.h.bf16 %v2471_v14  ;;  %v2472_v24 = vunpack.i.l.bf16 %v2471_v14 }
 0x1de   : > { %v1476_v35 = vsel %vm1461_vm10, %v1443_v31, %v2477_v7  ;;  %v1477_v27 = vsel %vm1461_vm10, %v1444_v37, %v2478_v23 }
 0x1df   : > { %v1501_v10 = vpack.c.bf16 %v1477_v27, %v1476_v35  ;;  %v1468_v34 = vsel %vm1461_vm10, %v1435_v0, %v2472_v24  ;;  %v1469_v51 = vsel %vm1461_vm10, %v1436_v55, %v2473_v52 }
 0x1e0   : > { %v1497_v42 = vpack.c.bf16 %v1469_v51, %v1468_v34 }
 0x1e1   : > { %1805 = vmatmul.msk.bf16.gmra.mxu1 %vm1521_vm12, %v1501_v10 }
 0x1e2   : > { %1801 = vmatmul.msk.bf16.gmra.mxu0 %vm1521_vm12, %v1497_v42 }
 0x206   : > { %v1626_v33 = vpop.f32.mrf.mxu2 }
 0x207   : > { %v1627_v32 = vadd.f32 %v3920_v3, %v1626_v33 }
 0x209   : > { %v1682_v17 = vmax.f32 %v1627_v32, 0.0 }
 0x20b   : > { %1715 = vst.msk [vmem:[%s3927_s8 + $0x80] sm:$0xff] %vm1698_vm13, %v1682_v17 }
 0x20d   : > { %v1646_v59 = vpop.f32.mrf.mxu3 }
 0x20e   : > { %v1606_v58 = vpop.f32.mrf.mxu1  ;;  %v1647_v44 = vadd.f32 %v3920_v3, %v1646_v59  ;;  %v1628_v15 = vpop.f32.mrf.mxu2 }
 0x20f   : > { %v1607_v61 = vadd.f32 %v3920_v3, %v1606_v58  ;;  %v1629_v38 = vadd.f32 %v3920_v3, %v1628_v15  ;;  %v1586_v63 = vpop.f32.mrf.mxu0 }
 0x210   : > { %v1690_v20 = vmax.f32 %v1647_v44, 0.0  ;;  %v1587_v8 = vadd.f32 %v3920_v3, %v1586_v63 }
 0x211   : > { %v1683_v26 = vmax.f32 %v1629_v38, 0.0  ;;  %v1674_v18 = vmax.f32 %v1607_v61, 0.0 }
 0x212   : > { %1723 = vst.msk [vmem:[%s3927_s8 + $0xc0] sm:$0xff] %vm1698_vm13, %v1690_v20  ;;  %v1666_v53 = vmax.f32 %v1587_v8, 0.0 }
 0x213   : > { %1716 = vst.msk [vmem:[%s3927_s8 + $0x88] sm:$0xff] %vm1698_vm13, %v1683_v26 }
 0x214   : > { %1699 = vst.msk [vmem:[%s3927_s8] sm:$0xff] %vm1698_vm13, %v1666_v53 }
 0x215   : > { %1707 = vst.msk [vmem:[%s3927_s8 + $0x40] sm:$0xff] %vm1698_vm13, %v1674_v18  ;;  %v1648_v25 = vpop.f32.mrf.mxu3 }
 0x216   : > { %v1608_v2 = vpop.f32.mrf.mxu1  ;;  %v1649_v41 = vadd.f32 %v3920_v3, %v1648_v25 }
 0x217   : > { %v1609_v12 = vadd.f32 %v3920_v3, %v1608_v2  ;;  %v1588_v46 = vpop.f32.mrf.mxu0 }
 0x218   : > { %v1691_v30 = vmax.f32 %v1649_v41, 0.0  ;;  %v1589_v49 = vadd.f32 %v3920_v3, %v1588_v46 }
 0x219   : > { %v1675_v45 = vmax.f32 %v1609_v12, 0.0 }
 0x21a   : > { %1724 = vst.msk [vmem:[%s3927_s8 + $0xc8] sm:$0xff] %vm1698_vm13, %v1691_v30  ;;  %v1667_v56 = vmax.f32 %v1589_v49, 0.0 }
 0x21b   : > { %1708 = vst.msk [vmem:[%s3927_s8 + $0x48] sm:$0xff] %vm1698_vm13, %v1675_v45 }
 0x21c   : > { %1700 = vst.msk [vmem:[%s3927_s8 + $0x8] sm:$0xff] %vm1698_vm13, %v1667_v56 }
 0x224   : > { %v1651_v62 = vpop.f32.mrf.mxu3 }
 0x225   : > { %v1652_v5 = vadd.f32 %v3920_v3, %v1651_v62  ;;  %v1631_v57 = vpop.f32.mrf.mxu2 }
 0x226   : > { %v1591_v48 = vpop.f32.mrf.mxu0  ;;  %v1632_v29 = vadd.f32 %v3920_v3, %v1631_v57 }
 0x227   : > { %v1692_v22 = vmax.f32 %v1652_v5, 0.0  ;;  %v1592_v50 = vadd.f32 %v3920_v3, %v1591_v48 }
 0x228   : > { %v1684_v11 = vmax.f32 %v1632_v29, 0.0  ;;  %v1611_v39 = vpop.f32.mrf.mxu1 }
 0x229   : > { %1725 = vst.msk [vmem:[%s3927_s8 + $0xd0] sm:$0xff] %vm1698_vm13, %v1692_v22  ;;  %v1668_v9 = vmax.f32 %v1592_v50, 0.0  ;;  %v1612_v13 = vadd.f32 %v3920_v3, %v1611_v39 }
 0x22a   : > { %1717 = vst.msk [vmem:[%s3927_s8 + $0x90] sm:$0xff] %vm1698_vm13, %v1684_v11 }
 0x22b   : > { %1701 = vst.msk [vmem:[%s3927_s8 + $0x10] sm:$0xff] %vm1698_vm13, %v1668_v9  ;;  %v1676_v21 = vmax.f32 %v1612_v13, 0.0 }
 0x22c   : > { %v1653_v36 = vpop.f32.mrf.mxu3 }
 0x22d   : > { %v1654_v16 = vadd.f32 %v3920_v3, %v1653_v36  ;;  %1709 = vst.msk [vmem:[%s3927_s8 + $0x50] sm:$0xff] %vm1698_vm13, %v1676_v21  ;;  %v1633_v40 = vpop.f32.mrf.mxu2 }
 0x22e   : > { %v1593_v43 = vpop.f32.mrf.mxu0  ;;  %v1634_v54 = vadd.f32 %v3920_v3, %v1633_v40 }
 0x22f   : > { %v1693_v4 = vmax.f32 %v1654_v16, 0.0  ;;  %v1594_v47 = vadd.f32 %v3920_v3, %v1593_v43 }
 0x230   : > { %v1685_v19 = vmax.f32 %v1634_v54, 0.0  ;;  %v1613_v60 = vpop.f32.mrf.mxu1 }
 0x231   : > { %1726 = vst.msk [vmem:[%s3927_s8 + $0xd8] sm:$0xff] %vm1698_vm13, %v1693_v4  ;;  %v1669_v28 = vmax.f32 %v1594_v47, 0.0  ;;  %v1614_v1 = vadd.f32 %v3920_v3, %v1613_v60 }
 0x232   : > { %1718 = vst.msk [vmem:[%s3927_s8 + $0x98] sm:$0xff] %vm1698_vm13, %v1685_v19 }
 0x233   : > { %1702 = vst.msk [vmem:[%s3927_s8 + $0x18] sm:$0xff] %vm1698_vm13, %v1669_v28  ;;  %v1677_v6 = vmax.f32 %v1614_v1, 0.0 }
 0x235   : > { %1710 = vst.msk [vmem:[%s3927_s8 + $0x58] sm:$0xff] %vm1698_vm13, %v1677_v6 }
 0x23c   : > { %v1636_v23 = vpop.f32.mrf.mxu2 }
 0x23d   : > { %v1637_v7 = vadd.f32 %v3920_v3, %v1636_v23 }
 0x23e   : > { %v1656_v37 = vpop.f32.mrf.mxu3 }
 0x23f   : > { %v1686_v31 = vmax.f32 %v1637_v7, 0.0  ;;  %v1657_v14 = vadd.f32 %v3920_v3, %v1656_v37 }
 0x240   : > { %v1596_v52 = vpop.f32.mrf.mxu0 }
 0x241   : > { %1719 = vst.msk [vmem:[%s3927_s8 + $0xa0] sm:$0xff] %vm1698_vm13, %v1686_v31  ;;  %v1694_v24 = vmax.f32 %v1657_v14, 0.0  ;;  %v1597_v35 = vadd.f32 %v3920_v3, %v1596_v52 }
 0x243   : > { %1727 = vst.msk [vmem:[%s3927_s8 + $0xe0] sm:$0xff] %vm1698_vm13, %v1694_v24  ;;  %v1670_v27 = vmax.f32 %v1597_v35, 0.0 }
 0x244   : > { %v1638_v0 = vpop.f32.mrf.mxu2 }
 0x245   : > { %v1639_v55 = vadd.f32 %v3920_v3, %v1638_v0  ;;  %1703 = vst.msk [vmem:[%s3927_s8 + $0x20] sm:$0xff] %vm1698_vm13, %v1670_v27 }
 0x246   : > { %v1658_v34 = vpop.f32.mrf.mxu3 }
 0x247   : > { %v1687_v10 = vmax.f32 %v1639_v55, 0.0  ;;  %v1659_v51 = vadd.f32 %v3920_v3, %v1658_v34  ;;  %v1616_v42 = vpop.f32.mrf.mxu1 }
 0x248   : > { %v1617_v33 = vadd.f32 %v3920_v3, %v1616_v42  ;;  %v1598_v32 = vpop.f32.mrf.mxu0 }
 0x249   : > { %1720 = vst.msk [vmem:[%s3927_s8 + $0xa8] sm:$0xff] %vm1698_vm13, %v1687_v10  ;;  %v1695_v17 = vmax.f32 %v1659_v51, 0.0  ;;  %v1599_v59 = vadd.f32 %v3920_v3, %v1598_v32 }
 0x24a   : > { %v1678_v58 = vmax.f32 %v1617_v33, 0.0 }
 0x24b   : > { %1728 = vst.msk [vmem:[%s3927_s8 + $0xe8] sm:$0xff] %vm1698_vm13, %v1695_v17  ;;  %v1671_v44 = vmax.f32 %v1599_v59, 0.0 }
 0x24c   : > { %1711 = vst.msk [vmem:[%s3927_s8 + $0x60] sm:$0xff] %vm1698_vm13, %v1678_v58 }
 0x24d   : > { %1704 = vst.msk [vmem:[%s3927_s8 + $0x28] sm:$0xff] %vm1698_vm13, %v1671_v44 }
 0x24f   : > { %v1618_v15 = vpop.f32.mrf.mxu1 }
 0x250   : > { %v1619_v61 = vadd.f32 %v3920_v3, %v1618_v15 }
 0x252   : > { %v1679_v38 = vmax.f32 %v1619_v61, 0.0 }
 0x254   : > { %1712 = vst.msk [vmem:[%s3927_s8 + $0x68] sm:$0xff] %vm1698_vm13, %v1679_v38 }
 0x256   : > { %v1641_v63 = vpop.f32.mrf.mxu2 }
 0x257   : > { %v1642_v20 = vadd.f32 %v3920_v3, %v1641_v63 }
 0x259   : > { %v1688_v8 = vmax.f32 %v1642_v20, 0.0 }
 0x25b   : > { %1721 = vst.msk [vmem:[%s3927_s8 + $0xb0] sm:$0xff] %vm1698_vm13, %v1688_v8 }
 0x25d   : > { %v1661_v26 = vpop.f32.mrf.mxu3 }
 0x25e   : > { %v1621_v18 = vpop.f32.mrf.mxu1  ;;  %v1662_v53 = vadd.f32 %v3920_v3, %v1661_v26  ;;  %v1643_v25 = vpop.f32.mrf.mxu2 }
 0x25f   : > { %v1622_v2 = vadd.f32 %v3920_v3, %v1621_v18  ;;  %v1644_v41 = vadd.f32 %v3920_v3, %v1643_v25  ;;  %v1601_v12 = vpop.f32.mrf.mxu0 }
 0x260   : > { %v1696_v46 = vmax.f32 %v1662_v53, 0.0  ;;  %v1602_v30 = vadd.f32 %v3920_v3, %v1601_v12 }
 0x261   : > { %v1689_v49 = vmax.f32 %v1644_v41, 0.0  ;;  %v1680_v45 = vmax.f32 %v1622_v2, 0.0 }
 0x262   : > { %1729 = vst.msk [vmem:[%s3927_s8 + $0xf0] sm:$0xff] %vm1698_vm13, %v1696_v46  ;;  %v1672_v56 = vmax.f32 %v1602_v30, 0.0 }
 0x263   : > { %1722 = vst.msk [vmem:[%s3927_s8 + $0xb8] sm:$0xff] %vm1698_vm13, %v1689_v49 }
 0x264   : > { %1705 = vst.msk [vmem:[%s3927_s8 + $0x30] sm:$0xff] %vm1698_vm13, %v1672_v56 }
 0x265   : > { %1713 = vst.msk [vmem:[%s3927_s8 + $0x70] sm:$0xff] %vm1698_vm13, %v1680_v45  ;;  %v1663_v62 = vpop.f32.mrf.mxu3 }
 0x266   : > { %v1623_v5 = vpop.f32.mrf.mxu1  ;;  %v1664_v57 = vadd.f32 %v3920_v3, %v1663_v62 }
 0x267   : > { %v1624_v48 = vadd.f32 %v3920_v3, %v1623_v5  ;;  %v1603_v29 = vpop.f32.mrf.mxu0 }
 0x268   : > { %v1697_v22 = vmax.f32 %v1664_v57, 0.0  ;;  %v1604_v50 = vadd.f32 %v3920_v3, %v1603_v29 }
 0x269   : > { %v1681_v11 = vmax.f32 %v1624_v48, 0.0 }
 0x26a   : > { %1730 = vst.msk [vmem:[%s3927_s8 + $0xf8] sm:$0xff] %vm1698_vm13, %v1697_v22  ;;  %v1673_v9 = vmax.f32 %v1604_v50, 0.0 }
 0x26b   : > { %1714 = vst.msk [vmem:[%s3927_s8 + $0x78] sm:$0xff] %vm1698_vm13, %v1681_v11 }
 0x26c   : > { %1706 = vst.msk [vmem:[%s3927_s8 + $0x38] sm:$0xff] %vm1698_vm13, %v1673_v9 }
 0x26d PF: > { %s13_s12 = sadd.s32 1, %s2514_s12  }
 0x26e   : > { %p10_p4 = scmp.ge.s32.totalorder %s13_s12, 4  }
 0x270   :  { %12 = sbr.rel (!%p10_p4) target bundleno = 1 (0x1), region = 62 }

</bundles_post_ra>
